<compile_context>
chip_gen: v7x
topology: tpu7x:2x2x1
jax: 0.10.0
libtpu: 0.0.40
codegen_flags: <defaults>
</compile_context>

<pallas_src>
import jax
import jax.numpy as jnp
import numpy as np
from jax import lax
from jax.experimental import pallas as pl
from jax.experimental.pallas import tpu as pltpu

# ----- static problem sizes (baked into the kernel) -----
B = 2            # batch
S = 8            # horizon (query length; also kv length of layers >= 1)
S_IN = 8         # kv length of the raw input sequence y (layer 0)
E = 32           # token_dim (embed dim)
D_OUT = 16       # output_dim
N_LAYERS = 3
N_HEAD = 4
HD = E // N_HEAD                  # 8
EPS = 1e-5                        # PyTorch LayerNorm default eps
SCALE = 1.0 / float(HD) ** 0.5

assert S_IN == S, "kernel assumes a uniform kv length across layers"

ROWS_Q = B * S                    # 16 query rows
ROWS_KV = B * S_IN                # 16 key/value rows (same every layer)
LK = N_HEAD * ROWS_KV             # 64 packed (head, batch, t) lane axis of the score slab

N_W = 5 * N_LAYERS + 1            # weight pieces: per layer w_k,w_v,w_o,w_fc,w_pj ; + w_out
N_B = 9 * N_LAYERS + 1            # per layer ln1_g,ln1_b,b_k,b_v,b_o,ln2_g,ln2_b,b_fc,b_pj ; + b_out


def _layer_norm(z, g, b):
    mu = jnp.mean(z, axis=-1, keepdims=True)
    var = jnp.mean(jnp.square(z - mu), axis=-1, keepdims=True)
    return (z - mu) * lax.rsqrt(var + EPS) * g + b


def decoder_kernel(q_ref, xq_ref, y_ref, w_ref, b_ref, o_ref):
    """Whole 3-layer cross-attention decoder; single invocation, everything in VMEM."""
    xq = xq_ref[...]                  # (ROWS_Q, E)  positional embedding (residual, every layer)
    y = y_ref[...]                    # (ROWS_KV, E) keys/values of layer 0

    # ---- layer-invariant constant masks for the lane-packed attention (hoisted) ----
    # Built from 2-D iota; shifts instead of integer division: HD = 8 (>>3), ROWS_KV = 16 (>>4).
    def it(shape, d):
        return lax.broadcasted_iota(jnp.int32, shape, d)

    one, zero, neg = jnp.float32(1.0), jnp.float32(0.0), jnp.float32(-1e30)
    # K block-diagonal (E, LK): feature lane i belongs to head i>>3, packed col j to head j>>4.
    kmask = jnp.where((it((E, LK), 0) >> 3) == (it((E, LK), 1) >> 4), one, zero)
    # V block-diagonal (LK, E).
    vmask = jnp.where((it((LK, E), 0) >> 4) == (it((LK, E), 1) >> 3), one, zero)
    # Softmax-denominator broadcast (LK, LK): ones inside each 16-lane head group.
    smask = jnp.where((it((LK, LK), 0) >> 4) == (it((LK, LK), 1) >> 4), one, zero)
    # Additive cross-batch mask (ROWS_Q, LK): query row r is batch r>>3, packed col j is (j>>3)&1.
    bmask = jnp.where((it((ROWS_Q, LK), 0) >> 3) == ((it((ROWS_Q, LK), 1) >> 3) & 1), zero, neg)

    def block(y_kv, l):
        wb, bb = 5 * l, 9 * l
        # ---- ln_1 on keys/values (query side is precomputed offline) ----
        yn = _layer_norm(y_kv, b_ref[bb + 0], b_ref[bb + 1])                     # (ROWS_KV, E)

        # ---- k / v projections (separate pieces keep every slab access leading-indexed) ----
        k = jnp.dot(yn, w_ref[wb + 0], preferred_element_type=jnp.float32) + b_ref[bb + 2]
        v = jnp.dot(yn, w_ref[wb + 1], preferred_element_type=jnp.float32) + b_ref[bb + 3]

        # ---- lane-packed multi-head attention: all B*N_HEAD pairs in one matmul each ----
        # k_bd (E, LK): columns ordered (head, batch, t); block-diagonal over heads.
        k_bd = jnp.concatenate([k.T] * N_HEAD, axis=1) * kmask
        # v_bd (LK, E): row (head, batch, t) holds v[batch, t, :], masked to that head's lanes.
        v_bd = jnp.concatenate([v] * N_HEAD, axis=0) * vmask

        q = q_ref[l]                                                             # (ROWS_Q, E), pre-scaled
        s = jnp.dot(q, k_bd, preferred_element_type=jnp.float32) + bmask         # (ROWS_Q, LK)
        # The row max (over all heads) is a per-row constant, hence a valid shift for every
        # per-head softmax group; masked lanes underflow to exactly 0 after exp.
        p = jnp.exp(s - jnp.max(s, axis=-1, keepdims=True))
        denom = jnp.dot(p, smask, preferred_element_type=jnp.float32)            # head sums, lane-broadcast
        p = p / denom
        ctx = jnp.dot(p, v_bd, preferred_element_type=jnp.float32)               # (ROWS_Q, E), heads on lanes

        # ---- out projection + residual with the (constant) query ----
        h = xq + jnp.dot(ctx, w_ref[wb + 2], preferred_element_type=jnp.float32) + b_ref[bb + 4]

        # ---- ln_2 -> c_fc -> QuickGELU -> c_proj -> residual ----
        hn = _layer_norm(h, b_ref[bb + 5], b_ref[bb + 6])
        fc = jnp.dot(hn, w_ref[wb + 3], preferred_element_type=jnp.float32) + b_ref[bb + 7]
        fc = fc / (1.0 + jnp.exp(-1.702 * fc))                                   # x * sigmoid(1.702 x)
        return h + jnp.dot(fc, w_ref[wb + 4], preferred_element_type=jnp.float32) + b_ref[bb + 8]

    for l in range(N_LAYERS):
        y = block(y, l)

    # ---- final Linear(token_dim, output_dim); weight piece zero-padded to (E, E) ----
    o_ref[...] = jnp.dot(y, w_ref[5 * N_LAYERS],
                         preferred_element_type=jnp.float32) + b_ref[9 * N_LAYERS]


@jax.jit
def transformer_decoder_forward(y, xq, q_slab, w_slab, b_slab):
    assert y.shape == (B, S_IN, E), y.shape
    assert xq.shape == (ROWS_Q, E) and q_slab.shape == (N_LAYERS, ROWS_Q, E)
    assert w_slab.shape == (N_W, E, E) and b_slab.shape == (N_B, 1, E)
    out = pl.pallas_call(
        decoder_kernel,
        out_shape=jax.ShapeDtypeStruct((ROWS_Q, E), jnp.float32),
        in_specs=[pl.BlockSpec(memory_space=pltpu.MemorySpace.VMEM)] * 5,
        out_specs=pl.BlockSpec(memory_space=pltpu.MemorySpace.VMEM),
    )(q_slab, xq, y.reshape(ROWS_KV, E), w_slab, b_slab)
    return out[:, :D_OUT].reshape(B, S, D_OUT)


# ----- parameters / packing -----
def init_params(key):
    ks = jax.random.split(key, 8 * N_LAYERS + 2)

    def w(k, shape, scale=0.1):
        return jax.random.normal(k, shape, jnp.float32) * scale

    layers = []
    for l in range(N_LAYERS):
        k = ks[8 * l:8 * (l + 1)]
        layers.append(dict(
            ln1_g=jnp.ones((E,), jnp.float32), ln1_b=jnp.zeros((E,), jnp.float32),
            w_in=w(k[0], (E, 3 * E)), b_in=w(k[1], (3 * E,), 0.02),   # [q|k|v], pre-transposed
            w_o=w(k[2], (E, E)),      b_o=w(k[3], (E,), 0.02),
            ln2_g=jnp.ones((E,), jnp.float32), ln2_b=jnp.zeros((E,), jnp.float32),
            w_fc=w(k[4], (E, E)),     b_fc=w(k[5], (E,), 0.02),
            w_pj=w(k[6], (E, E)),     b_pj=w(k[7], (E,), 0.02),
        ))
    return dict(layers=layers,
                w_out=w(ks[-2], (E, D_OUT)),
                b_out=w(ks[-1], (D_OUT,), 0.02))


def pack_params(params, pos_table):
    """Host-side packing: leading-indexed weight/bias slabs + the precomputed query path."""
    hi = lax.Precision.HIGHEST
    xq = jnp.tile(pos_table, (B, 1))                               # (ROWS_Q, E) constant residual
    w_pieces, b_pieces, q_layers = [], [], []
    for lp in params['layers']:
        w_pieces += [lp['w_in'][:, E:2 * E], lp['w_in'][:, 2 * E:],
                     lp['w_o'], lp['w_fc'], lp['w_pj']]
        b_pieces += [lp['ln1_g'], lp['ln1_b'],
                     lp['b_in'][E:2 * E], lp['b_in'][2 * E:], lp['b_o'],
                     lp['ln2_g'], lp['ln2_b'], lp['b_fc'], lp['b_pj']]
        # data-independent query path: ln_1(pos) -> q-projection -> 1/sqrt(head_dim) scale
        xn = _layer_norm(xq, lp['ln1_g'], lp['ln1_b'])
        q_layers.append((jnp.dot(xn, lp['w_in'][:, :E], precision=hi) + lp['b_in'][:E]) * SCALE)
    w_pieces.append(jnp.pad(params['w_out'], ((0, 0), (0, E - D_OUT))))
    b_pieces.append(jnp.pad(params['b_out'], (0, E - D_OUT)))
    w_slab = jnp.stack(w_pieces)                                   # (N_W, E, E)
    b_slab = jnp.stack(b_pieces)[:, None, :]                       # (N_B, 1, E)
    q_slab = jnp.stack(q_layers)                                   # (N_LAYERS, ROWS_Q, E)
    return xq, q_slab, w_slab, b_slab


def get_sinusoid_encoding_table(start, n_position, d_hid):
    pos = np.arange(start, n_position, dtype=np.float64)[:, None]
    i = np.arange(d_hid, dtype=np.float64)[None, :]
    angle = pos / np.power(10000.0, 2.0 * np.floor(i / 2.0) / d_hid)
    table = np.zeros((n_position - start, d_hid), dtype=np.float32)
    table[:, 0::2] = np.sin(angle[:, 0::2])
    table[:, 1::2] = np.cos(angle[:, 1::2])
    return jnp.asarray(table)                                       # (S, E)


# ----- pure-JAX reference (mirrors PyTorch semantics) -----
def reference_forward(y, pos_table, params):
    x = jnp.broadcast_to(pos_table[None], (B, S, E))
    for lp in params['layers']:
        s_kv = y.shape[1]
        xn = _layer_norm(x, lp['ln1_g'], lp['ln1_b'])
        yn = _layer_norm(y, lp['ln1_g'], lp['ln1_b'])
        q = xn @ lp['w_in'][:, :E] + lp['b_in'][:E]
        k = yn @ lp['w_in'][:, E:2 * E] + lp['b_in'][E:2 * E]
        v = yn @ lp['w_in'][:, 2 * E:] + lp['b_in'][2 * E:]
        qh = q.reshape(B, S, N_HEAD, HD)
        kh = k.reshape(B, s_kv, N_HEAD, HD)
        vh = v.reshape(B, s_kv, N_HEAD, HD)
        sc = jnp.einsum('bqhd,bkhd->bhqk', qh * SCALE, kh)
        p = jax.nn.softmax(sc, axis=-1)
        ctx = jnp.einsum('bhqk,bkhd->bqhd', p, vh).reshape(B, S, E)
        attn = ctx @ lp['w_o'] + lp['b_o']
        h = x + attn
        hn = _layer_norm(h, lp['ln2_g'], lp['ln2_b'])
        fc = hn @ lp['w_fc'] + lp['b_fc']
        fc = fc * jax.nn.sigmoid(1.702 * fc)
        y = h + fc @ lp['w_pj'] + lp['b_pj']
    return y @ params['w_out'] + params['b_out']


if __name__ == "__main__":
    key = jax.random.PRNGKey(0)
    pkey, ykey = jax.random.split(key)
    params = init_params(pkey)
    pos_table = get_sinusoid_encoding_table(0, S, E)
    xq, q_slab, w_slab, b_slab = pack_params(params, pos_table)
    y = jax.random.normal(ykey, (B, S_IN, E), jnp.float32)

    out = jax.block_until_ready(transformer_decoder_forward(y, xq, q_slab, w_slab, b_slab))

    # Reference at HIGHEST matmul precision; tolerance leaves headroom for TPU MXU f32
    # pass decomposition differences between the XLA reference and the Mosaic kernel.
    with jax.default_matmul_precision("highest"):
        ref = jax.block_until_ready(reference_forward(y, pos_table, params))
    np.testing.assert_allclose(np.asarray(out), np.asarray(ref), rtol=2e-2, atol=2e-2)
    print("KERNEL_OK")
</pallas_src>

<mosaic_0001>
module attributes {stable_mosaic.version = 11 : i64} {
  func.func @decoder_kernel(%arg0: memref<3x16x32xf32, #tpu.memory_space<vmem>>, %arg1: memref<16x32xf32, #tpu.memory_space<vmem>>, %arg2: memref<16x32xf32, #tpu.memory_space<vmem>>, %arg3: memref<16x32x32xf32, #tpu.memory_space<vmem>>, %arg4: memref<28x1x32xf32, #tpu.memory_space<vmem>>, %arg5: memref<16x32xf32, #tpu.memory_space<vmem>>) attributes {dimension_semantics = [], scalar_prefetch = 0 : i64, scratch_operands = 0 : i64, tpu.core_type = #tpu.core_type<tc>} {
    %c0 = arith.constant 0 : index
    %c0_0 = arith.constant 0 : index
    %0 = vector.load %arg1[%c0, %c0_0] : memref<16x32xf32, #tpu.memory_space<vmem>>, vector<16x32xf32>
    %c0_1 = arith.constant 0 : index
    %c0_2 = arith.constant 0 : index
    %1 = vector.load %arg2[%c0_1, %c0_2] : memref<16x32xf32, #tpu.memory_space<vmem>>, vector<16x32xf32>
    %2 = tpu.iota {dimensions = array<i32: 0>} : vector<32x64xi32>
    %c3_i32 = arith.constant 3 : i32
    %3 = vector.broadcast %c3_i32 : i32 to vector<32x64xi32>
    %4 = arith.shrsi %2, %3 : vector<32x64xi32>
    %5 = tpu.iota {dimensions = array<i32: 1>} : vector<32x64xi32>
    %c4_i32 = arith.constant 4 : i32
    %6 = vector.broadcast %c4_i32 : i32 to vector<32x64xi32>
    %7 = arith.shrsi %5, %6 : vector<32x64xi32>
    %8 = arith.cmpi eq, %4, %7 : vector<32x64xi32>
    %cst = arith.constant 1.000000e+00 : f32
    %cst_3 = arith.constant 0.000000e+00 : f32
    %9 = vector.broadcast %cst : f32 to vector<32x64xf32>
    %10 = vector.broadcast %cst_3 : f32 to vector<32x64xf32>
    %11 = arith.select %8, %9, %10 : vector<32x64xi1>, vector<32x64xf32>
    %12 = tpu.iota {dimensions = array<i32: 0>} : vector<64x32xi32>
    %c4_i32_4 = arith.constant 4 : i32
    %13 = vector.broadcast %c4_i32_4 : i32 to vector<64x32xi32>
    %14 = arith.shrsi %12, %13 : vector<64x32xi32>
    %15 = tpu.iota {dimensions = array<i32: 1>} : vector<64x32xi32>
    %c3_i32_5 = arith.constant 3 : i32
    %16 = vector.broadcast %c3_i32_5 : i32 to vector<64x32xi32>
    %17 = arith.shrsi %15, %16 : vector<64x32xi32>
    %18 = arith.cmpi eq, %14, %17 : vector<64x32xi32>
    %cst_6 = arith.constant 1.000000e+00 : f32
    %cst_7 = arith.constant 0.000000e+00 : f32
    %19 = vector.broadcast %cst_6 : f32 to vector<64x32xf32>
    %20 = vector.broadcast %cst_7 : f32 to vector<64x32xf32>
    %21 = arith.select %18, %19, %20 : vector<64x32xi1>, vector<64x32xf32>
    %22 = tpu.iota {dimensions = array<i32: 0>} : vector<64x64xi32>
    %c4_i32_8 = arith.constant 4 : i32
    %23 = vector.broadcast %c4_i32_8 : i32 to vector<64x64xi32>
    %24 = arith.shrsi %22, %23 : vector<64x64xi32>
    %25 = tpu.iota {dimensions = array<i32: 1>} : vector<64x64xi32>
    %c4_i32_9 = arith.constant 4 : i32
    %26 = vector.broadcast %c4_i32_9 : i32 to vector<64x64xi32>
    %27 = arith.shrsi %25, %26 : vector<64x64xi32>
    %28 = arith.cmpi eq, %24, %27 : vector<64x64xi32>
    %cst_10 = arith.constant 1.000000e+00 : f32
    %cst_11 = arith.constant 0.000000e+00 : f32
    %29 = vector.broadcast %cst_10 : f32 to vector<64x64xf32>
    %30 = vector.broadcast %cst_11 : f32 to vector<64x64xf32>
    %31 = arith.select %28, %29, %30 : vector<64x64xi1>, vector<64x64xf32>
    %32 = tpu.iota {dimensions = array<i32: 0>} : vector<16x64xi32>
    %c3_i32_12 = arith.constant 3 : i32
    %33 = vector.broadcast %c3_i32_12 : i32 to vector<16x64xi32>
    %34 = arith.shrsi %32, %33 : vector<16x64xi32>
    %35 = tpu.iota {dimensions = array<i32: 1>} : vector<16x64xi32>
    %c3_i32_13 = arith.constant 3 : i32
    %36 = vector.broadcast %c3_i32_13 : i32 to vector<16x64xi32>
    %37 = arith.shrsi %35, %36 : vector<16x64xi32>
    %c1_i32 = arith.constant 1 : i32
    %38 = vector.broadcast %c1_i32 : i32 to vector<16x64xi32>
    %39 = arith.andi %37, %38 : vector<16x64xi32>
    %40 = arith.cmpi eq, %34, %39 : vector<16x64xi32>
    %cst_14 = arith.constant 0.000000e+00 : f32
    %cst_15 = arith.constant -1.000000e+30 : f32
    %41 = vector.broadcast %cst_14 : f32 to vector<16x64xf32>
    %42 = vector.broadcast %cst_15 : f32 to vector<16x64xf32>
    %43 = arith.select %40, %41, %42 : vector<16x64xi1>, vector<16x64xf32>
    %c0_16 = arith.constant 0 : index
    %c0_17 = arith.constant 0 : index
    %c0_18 = arith.constant 0 : index
    %44 = vector.load %arg4[%c0_16, %c0_17, %c0_18] : memref<28x1x32xf32, #tpu.memory_space<vmem>>, vector<1x1x32xf32>
    %45 = vector.shape_cast %44 : vector<1x1x32xf32> to vector<1x32xf32>
    %c1 = arith.constant 1 : index
    %c0_19 = arith.constant 0 : index
    %c0_20 = arith.constant 0 : index
    %46 = vector.load %arg4[%c1, %c0_19, %c0_20] : memref<28x1x32xf32, #tpu.memory_space<vmem>>, vector<1x1x32xf32>
    %47 = vector.shape_cast %46 : vector<1x1x32xf32> to vector<1x32xf32>
    %cst_21 = arith.constant dense<0.000000e+00> : vector<16xf32>
    %48 = vector.multi_reduction <add>, %1, %cst_21 [1] : vector<16x32xf32> to vector<16xf32>
    %49 = vector.shape_cast %48 : vector<16xf32> to vector<16x1xf32>
    %cst_22 = arith.constant 3.200000e+01 : f32
    %50 = vector.broadcast %cst_22 : f32 to vector<16x1xf32>
    %51 = arith.divf %49, %50 : vector<16x1xf32>
    %52 = vector.broadcast %51 : vector<16x1xf32> to vector<16x32xf32>
    %53 = arith.subf %1, %52 : vector<16x32xf32>
    %54 = arith.mulf %53, %53 : vector<16x32xf32>
    %cst_23 = arith.constant dense<0.000000e+00> : vector<16xf32>
    %55 = vector.multi_reduction <add>, %54, %cst_23 [1] : vector<16x32xf32> to vector<16xf32>
    %56 = vector.shape_cast %55 : vector<16xf32> to vector<16x1xf32>
    %cst_24 = arith.constant 3.200000e+01 : f32
    %57 = vector.broadcast %cst_24 : f32 to vector<16x1xf32>
    %58 = arith.divf %56, %57 : vector<16x1xf32>
    %59 = vector.broadcast %51 : vector<16x1xf32> to vector<16x32xf32>
    %60 = arith.subf %1, %59 : vector<16x32xf32>
    %cst_25 = arith.constant 9.99999974E-6 : f32
    %61 = vector.broadcast %cst_25 : f32 to vector<16x1xf32>
    %62 = arith.addf %58, %61 : vector<16x1xf32>
    %63 = math.rsqrt %62 : vector<16x1xf32>
    %64 = vector.broadcast %63 : vector<16x1xf32> to vector<16x32xf32>
    %65 = arith.mulf %60, %64 : vector<16x32xf32>
    %66 = vector.broadcast %45 : vector<1x32xf32> to vector<16x32xf32>
    %67 = arith.mulf %65, %66 : vector<16x32xf32>
    %68 = vector.broadcast %47 : vector<1x32xf32> to vector<16x32xf32>
    %69 = arith.addf %67, %68 : vector<16x32xf32>
    %c0_26 = arith.constant 0 : index
    %c0_27 = arith.constant 0 : index
    %c0_28 = arith.constant 0 : index
    %70 = vector.load %arg3[%c0_26, %c0_27, %c0_28] : memref<16x32x32xf32, #tpu.memory_space<vmem>>, vector<1x32x32xf32>
    %71 = vector.shape_cast %70 : vector<1x32x32xf32> to vector<32x32xf32>
    %cst_29 = arith.constant dense<0.000000e+00> : vector<16x32xf32>
    %72 = tpu.matmul %69, %71, %cst_29 {dimension_numbers = #tpu.dot_dimension_numbers<[1], [0], [0], [1], [0, 0, 1, 1], [], []>} : vector<16x32xf32>, vector<32x32xf32>, vector<16x32xf32> -> vector<16x32xf32>
    %c2 = arith.constant 2 : index
    %c0_30 = arith.constant 0 : index
    %c0_31 = arith.constant 0 : index
    %73 = vector.load %arg4[%c2, %c0_30, %c0_31] : memref<28x1x32xf32, #tpu.memory_space<vmem>>, vector<1x1x32xf32>
    %74 = vector.shape_cast %73 : vector<1x1x32xf32> to vector<1x32xf32>
    %75 = vector.broadcast %74 : vector<1x32xf32> to vector<16x32xf32>
    %76 = arith.addf %72, %75 : vector<16x32xf32>
    %c1_32 = arith.constant 1 : index
    %c0_33 = arith.constant 0 : index
    %c0_34 = arith.constant 0 : index
    %77 = vector.load %arg3[%c1_32, %c0_33, %c0_34] : memref<16x32x32xf32, #tpu.memory_space<vmem>>, vector<1x32x32xf32>
    %78 = vector.shape_cast %77 : vector<1x32x32xf32> to vector<32x32xf32>
    %cst_35 = arith.constant dense<0.000000e+00> : vector<16x32xf32>
    %79 = tpu.matmul %69, %78, %cst_35 {dimension_numbers = #tpu.dot_dimension_numbers<[1], [0], [0], [1], [0, 0, 1, 1], [], []>} : vector<16x32xf32>, vector<32x32xf32>, vector<16x32xf32> -> vector<16x32xf32>
    %c3 = arith.constant 3 : index
    %c0_36 = arith.constant 0 : index
    %c0_37 = arith.constant 0 : index
    %80 = vector.load %arg4[%c3, %c0_36, %c0_37] : memref<28x1x32xf32, #tpu.memory_space<vmem>>, vector<1x1x32xf32>
    %81 = vector.shape_cast %80 : vector<1x1x32xf32> to vector<1x32xf32>
    %82 = vector.broadcast %81 : vector<1x32xf32> to vector<16x32xf32>
    %83 = arith.addf %79, %82 : vector<16x32xf32>
    %84 = tpu.transpose %76, [1, 0] : vector<16x32xf32> -> vector<32x16xf32>
    %85 = tpu.concatenate %84, %84, %84, %84 in 1 : vector<32x16xf32>, vector<32x16xf32>, vector<32x16xf32>, vector<32x16xf32> -> vector<32x64xf32>
    %86 = arith.mulf %85, %11 : vector<32x64xf32>
    %87 = tpu.concatenate %83, %83, %83, %83 in 0 : vector<16x32xf32>, vector<16x32xf32>, vector<16x32xf32>, vector<16x32xf32> -> vector<64x32xf32>
    %88 = arith.mulf %87, %21 : vector<64x32xf32>
    %c0_38 = arith.constant 0 : index
    %c0_39 = arith.constant 0 : index
    %c0_40 = arith.constant 0 : index
    %89 = vector.load %arg0[%c0_38, %c0_39, %c0_40] : memref<3x16x32xf32, #tpu.memory_space<vmem>>, vector<1x16x32xf32>
    %90 = vector.shape_cast %89 : vector<1x16x32xf32> to vector<16x32xf32>
    %cst_41 = arith.constant dense<0.000000e+00> : vector<16x64xf32>
    %91 = tpu.matmul %90, %86, %cst_41 {dimension_numbers = #tpu.dot_dimension_numbers<[1], [0], [0], [1], [0, 0, 1, 1], [], []>} : vector<16x32xf32>, vector<32x64xf32>, vector<16x64xf32> -> vector<16x64xf32>
    %92 = arith.addf %91, %43 : vector<16x64xf32>
    %cst_42 = arith.constant dense<0xFF800000> : vector<16xf32>
    %93 = vector.multi_reduction <maximumf>, %92, %cst_42 [1] : vector<16x64xf32> to vector<16xf32>
    %94 = vector.shape_cast %93 : vector<16xf32> to vector<16x1xf32>
    %95 = vector.broadcast %94 : vector<16x1xf32> to vector<16x64xf32>
    %96 = arith.subf %92, %95 : vector<16x64xf32>
    %97 = math.exp %96 : vector<16x64xf32>
    %cst_43 = arith.constant dense<0.000000e+00> : vector<16x64xf32>
    %98 = tpu.matmul %97, %31, %cst_43 {dimension_numbers = #tpu.dot_dimension_numbers<[1], [0], [0], [1], [0, 0, 1, 1], [], []>} : vector<16x64xf32>, vector<64x64xf32>, vector<16x64xf32> -> vector<16x64xf32>
    %99 = arith.divf %97, %98 : vector<16x64xf32>
    %cst_44 = arith.constant dense<0.000000e+00> : vector<16x32xf32>
    %100 = tpu.matmul %99, %88, %cst_44 {dimension_numbers = #tpu.dot_dimension_numbers<[1], [0], [0], [1], [0, 0, 1, 1], [], []>} : vector<16x64xf32>, vector<64x32xf32>, vector<16x32xf32> -> vector<16x32xf32>
    %c2_45 = arith.constant 2 : index
    %c0_46 = arith.constant 0 : index
    %c0_47 = arith.constant 0 : index
    %101 = vector.load %arg3[%c2_45, %c0_46, %c0_47] : memref<16x32x32xf32, #tpu.memory_space<vmem>>, vector<1x32x32xf32>
    %102 = vector.shape_cast %101 : vector<1x32x32xf32> to vector<32x32xf32>
    %cst_48 = arith.constant dense<0.000000e+00> : vector<16x32xf32>
    %103 = tpu.matmul %100, %102, %cst_48 {dimension_numbers = #tpu.dot_dimension_numbers<[1], [0], [0], [1], [0, 0, 1, 1], [], []>} : vector<16x32xf32>, vector<32x32xf32>, vector<16x32xf32> -> vector<16x32xf32>
    %104 = arith.addf %0, %103 : vector<16x32xf32>
    %c4 = arith.constant 4 : index
    %c0_49 = arith.constant 0 : index
    %c0_50 = arith.constant 0 : index
    %105 = vector.load %arg4[%c4, %c0_49, %c0_50] : memref<28x1x32xf32, #tpu.memory_space<vmem>>, vector<1x1x32xf32>
    %106 = vector.shape_cast %105 : vector<1x1x32xf32> to vector<1x32xf32>
    %107 = vector.broadcast %106 : vector<1x32xf32> to vector<16x32xf32>
    %108 = arith.addf %104, %107 : vector<16x32xf32>
    %c5 = arith.constant 5 : index
    %c0_51 = arith.constant 0 : index
    %c0_52 = arith.constant 0 : index
    %109 = vector.load %arg4[%c5, %c0_51, %c0_52] : memref<28x1x32xf32, #tpu.memory_space<vmem>>, vector<1x1x32xf32>
    %110 = vector.shape_cast %109 : vector<1x1x32xf32> to vector<1x32xf32>
    %c6 = arith.constant 6 : index
    %c0_53 = arith.constant 0 : index
    %c0_54 = arith.constant 0 : index
    %111 = vector.load %arg4[%c6, %c0_53, %c0_54] : memref<28x1x32xf32, #tpu.memory_space<vmem>>, vector<1x1x32xf32>
    %112 = vector.shape_cast %111 : vector<1x1x32xf32> to vector<1x32xf32>
    %cst_55 = arith.constant dense<0.000000e+00> : vector<16xf32>
    %113 = vector.multi_reduction <add>, %108, %cst_55 [1] : vector<16x32xf32> to vector<16xf32>
    %114 = vector.shape_cast %113 : vector<16xf32> to vector<16x1xf32>
    %cst_56 = arith.constant 3.200000e+01 : f32
    %115 = vector.broadcast %cst_56 : f32 to vector<16x1xf32>
    %116 = arith.divf %114, %115 : vector<16x1xf32>
    %117 = vector.broadcast %116 : vector<16x1xf32> to vector<16x32xf32>
    %118 = arith.subf %108, %117 : vector<16x32xf32>
    %119 = arith.mulf %118, %118 : vector<16x32xf32>
    %cst_57 = arith.constant dense<0.000000e+00> : vector<16xf32>
    %120 = vector.multi_reduction <add>, %119, %cst_57 [1] : vector<16x32xf32> to vector<16xf32>
    %121 = vector.shape_cast %120 : vector<16xf32> to vector<16x1xf32>
    %cst_58 = arith.constant 3.200000e+01 : f32
    %122 = vector.broadcast %cst_58 : f32 to vector<16x1xf32>
    %123 = arith.divf %121, %122 : vector<16x1xf32>
    %124 = vector.broadcast %116 : vector<16x1xf32> to vector<16x32xf32>
    %125 = arith.subf %108, %124 : vector<16x32xf32>
    %cst_59 = arith.constant 9.99999974E-6 : f32
    %126 = vector.broadcast %cst_59 : f32 to vector<16x1xf32>
    %127 = arith.addf %123, %126 : vector<16x1xf32>
    %128 = math.rsqrt %127 : vector<16x1xf32>
    %129 = vector.broadcast %128 : vector<16x1xf32> to vector<16x32xf32>
    %130 = arith.mulf %125, %129 : vector<16x32xf32>
    %131 = vector.broadcast %110 : vector<1x32xf32> to vector<16x32xf32>
    %132 = arith.mulf %130, %131 : vector<16x32xf32>
    %133 = vector.broadcast %112 : vector<1x32xf32> to vector<16x32xf32>
    %134 = arith.addf %132, %133 : vector<16x32xf32>
    %c3_60 = arith.constant 3 : index
    %c0_61 = arith.constant 0 : index
    %c0_62 = arith.constant 0 : index
    %135 = vector.load %arg3[%c3_60, %c0_61, %c0_62] : memref<16x32x32xf32, #tpu.memory_space<vmem>>, vector<1x32x32xf32>
    %136 = vector.shape_cast %135 : vector<1x32x32xf32> to vector<32x32xf32>
    %cst_63 = arith.constant dense<0.000000e+00> : vector<16x32xf32>
    %137 = tpu.matmul %134, %136, %cst_63 {dimension_numbers = #tpu.dot_dimension_numbers<[1], [0], [0], [1], [0, 0, 1, 1], [], []>} : vector<16x32xf32>, vector<32x32xf32>, vector<16x32xf32> -> vector<16x32xf32>
    %c7 = arith.constant 7 : index
    %c0_64 = arith.constant 0 : index
    %c0_65 = arith.constant 0 : index
    %138 = vector.load %arg4[%c7, %c0_64, %c0_65] : memref<28x1x32xf32, #tpu.memory_space<vmem>>, vector<1x1x32xf32>
    %139 = vector.shape_cast %138 : vector<1x1x32xf32> to vector<1x32xf32>
    %140 = vector.broadcast %139 : vector<1x32xf32> to vector<16x32xf32>
    %141 = arith.addf %137, %140 : vector<16x32xf32>
    %cst_66 = arith.constant -1.702000e+00 : f32
    %142 = vector.broadcast %cst_66 : f32 to vector<16x32xf32>
    %143 = arith.mulf %142, %141 : vector<16x32xf32>
    %144 = math.exp %143 : vector<16x32xf32>
    %cst_67 = arith.constant 1.000000e+00 : f32
    %145 = vector.broadcast %cst_67 : f32 to vector<16x32xf32>
    %146 = arith.addf %145, %144 : vector<16x32xf32>
    %147 = arith.divf %141, %146 : vector<16x32xf32>
    %c4_68 = arith.constant 4 : index
    %c0_69 = arith.constant 0 : index
    %c0_70 = arith.constant 0 : index
    %148 = vector.load %arg3[%c4_68, %c0_69, %c0_70] : memref<16x32x32xf32, #tpu.memory_space<vmem>>, vector<1x32x32xf32>
    %149 = vector.shape_cast %148 : vector<1x32x32xf32> to vector<32x32xf32>
    %cst_71 = arith.constant dense<0.000000e+00> : vector<16x32xf32>
    %150 = tpu.matmul %147, %149, %cst_71 {dimension_numbers = #tpu.dot_dimension_numbers<[1], [0], [0], [1], [0, 0, 1, 1], [], []>} : vector<16x32xf32>, vector<32x32xf32>, vector<16x32xf32> -> vector<16x32xf32>
    %151 = arith.addf %108, %150 : vector<16x32xf32>
    %c8 = arith.constant 8 : index
    %c0_72 = arith.constant 0 : index
    %c0_73 = arith.constant 0 : index
    %152 = vector.load %arg4[%c8, %c0_72, %c0_73] : memref<28x1x32xf32, #tpu.memory_space<vmem>>, vector<1x1x32xf32>
    %153 = vector.shape_cast %152 : vector<1x1x32xf32> to vector<1x32xf32>
    %154 = vector.broadcast %153 : vector<1x32xf32> to vector<16x32xf32>
    %155 = arith.addf %151, %154 : vector<16x32xf32>
    %c9 = arith.constant 9 : index
    %c0_74 = arith.constant 0 : index
    %c0_75 = arith.constant 0 : index
    %156 = vector.load %arg4[%c9, %c0_74, %c0_75] : memref<28x1x32xf32, #tpu.memory_space<vmem>>, vector<1x1x32xf32>
    %157 = vector.shape_cast %156 : vector<1x1x32xf32> to vector<1x32xf32>
    %c10 = arith.constant 10 : index
    %c0_76 = arith.constant 0 : index
    %c0_77 = arith.constant 0 : index
    %158 = vector.load %arg4[%c10, %c0_76, %c0_77] : memref<28x1x32xf32, #tpu.memory_space<vmem>>, vector<1x1x32xf32>
    %159 = vector.shape_cast %158 : vector<1x1x32xf32> to vector<1x32xf32>
    %cst_78 = arith.constant dense<0.000000e+00> : vector<16xf32>
    %160 = vector.multi_reduction <add>, %155, %cst_78 [1] : vector<16x32xf32> to vector<16xf32>
    %161 = vector.shape_cast %160 : vector<16xf32> to vector<16x1xf32>
    %cst_79 = arith.constant 3.200000e+01 : f32
    %162 = vector.broadcast %cst_79 : f32 to vector<16x1xf32>
    %163 = arith.divf %161, %162 : vector<16x1xf32>
    %164 = vector.broadcast %163 : vector<16x1xf32> to vector<16x32xf32>
    %165 = arith.subf %155, %164 : vector<16x32xf32>
    %166 = arith.mulf %165, %165 : vector<16x32xf32>
    %cst_80 = arith.constant dense<0.000000e+00> : vector<16xf32>
    %167 = vector.multi_reduction <add>, %166, %cst_80 [1] : vector<16x32xf32> to vector<16xf32>
    %168 = vector.shape_cast %167 : vector<16xf32> to vector<16x1xf32>
    %cst_81 = arith.constant 3.200000e+01 : f32
    %169 = vector.broadcast %cst_81 : f32 to vector<16x1xf32>
    %170 = arith.divf %168, %169 : vector<16x1xf32>
    %171 = vector.broadcast %163 : vector<16x1xf32> to vector<16x32xf32>
    %172 = arith.subf %155, %171 : vector<16x32xf32>
    %cst_82 = arith.constant 9.99999974E-6 : f32
    %173 = vector.broadcast %cst_82 : f32 to vector<16x1xf32>
    %174 = arith.addf %170, %173 : vector<16x1xf32>
    %175 = math.rsqrt %174 : vector<16x1xf32>
    %176 = vector.broadcast %175 : vector<16x1xf32> to vector<16x32xf32>
    %177 = arith.mulf %172, %176 : vector<16x32xf32>
    %178 = vector.broadcast %157 : vector<1x32xf32> to vector<16x32xf32>
    %179 = arith.mulf %177, %178 : vector<16x32xf32>
    %180 = vector.broadcast %159 : vector<1x32xf32> to vector<16x32xf32>
    %181 = arith.addf %179, %180 : vector<16x32xf32>
    %c5_83 = arith.constant 5 : index
    %c0_84 = arith.constant 0 : index
    %c0_85 = arith.constant 0 : index
    %182 = vector.load %arg3[%c5_83, %c0_84, %c0_85] : memref<16x32x32xf32, #tpu.memory_space<vmem>>, vector<1x32x32xf32>
    %183 = vector.shape_cast %182 : vector<1x32x32xf32> to vector<32x32xf32>
    %cst_86 = arith.constant dense<0.000000e+00> : vector<16x32xf32>
    %184 = tpu.matmul %181, %183, %cst_86 {dimension_numbers = #tpu.dot_dimension_numbers<[1], [0], [0], [1], [0, 0, 1, 1], [], []>} : vector<16x32xf32>, vector<32x32xf32>, vector<16x32xf32> -> vector<16x32xf32>
    %c11 = arith.constant 11 : index
    %c0_87 = arith.constant 0 : index
    %c0_88 = arith.constant 0 : index
    %185 = vector.load %arg4[%c11, %c0_87, %c0_88] : memref<28x1x32xf32, #tpu.memory_space<vmem>>, vector<1x1x32xf32>
    %186 = vector.shape_cast %185 : vector<1x1x32xf32> to vector<1x32xf32>
    %187 = vector.broadcast %186 : vector<1x32xf32> to vector<16x32xf32>
    %188 = arith.addf %184, %187 : vector<16x32xf32>
    %c6_89 = arith.constant 6 : index
    %c0_90 = arith.constant 0 : index
    %c0_91 = arith.constant 0 : index
    %189 = vector.load %arg3[%c6_89, %c0_90, %c0_91] : memref<16x32x32xf32, #tpu.memory_space<vmem>>, vector<1x32x32xf32>
    %190 = vector.shape_cast %189 : vector<1x32x32xf32> to vector<32x32xf32>
    %cst_92 = arith.constant dense<0.000000e+00> : vector<16x32xf32>
    %191 = tpu.matmul %181, %190, %cst_92 {dimension_numbers = #tpu.dot_dimension_numbers<[1], [0], [0], [1], [0, 0, 1, 1], [], []>} : vector<16x32xf32>, vector<32x32xf32>, vector<16x32xf32> -> vector<16x32xf32>
    %c12 = arith.constant 12 : index
    %c0_93 = arith.constant 0 : index
    %c0_94 = arith.constant 0 : index
    %192 = vector.load %arg4[%c12, %c0_93, %c0_94] : memref<28x1x32xf32, #tpu.memory_space<vmem>>, vector<1x1x32xf32>
    %193 = vector.shape_cast %192 : vector<1x1x32xf32> to vector<1x32xf32>
    %194 = vector.broadcast %193 : vector<1x32xf32> to vector<16x32xf32>
    %195 = arith.addf %191, %194 : vector<16x32xf32>
    %196 = tpu.transpose %188, [1, 0] : vector<16x32xf32> -> vector<32x16xf32>
    %197 = tpu.concatenate %196, %196, %196, %196 in 1 : vector<32x16xf32>, vector<32x16xf32>, vector<32x16xf32>, vector<32x16xf32> -> vector<32x64xf32>
    %198 = arith.mulf %197, %11 : vector<32x64xf32>
    %199 = tpu.concatenate %195, %195, %195, %195 in 0 : vector<16x32xf32>, vector<16x32xf32>, vector<16x32xf32>, vector<16x32xf32> -> vector<64x32xf32>
    %200 = arith.mulf %199, %21 : vector<64x32xf32>
    %c1_95 = arith.constant 1 : index
    %c0_96 = arith.constant 0 : index
    %c0_97 = arith.constant 0 : index
    %201 = vector.load %arg0[%c1_95, %c0_96, %c0_97] : memref<3x16x32xf32, #tpu.memory_space<vmem>>, vector<1x16x32xf32>
    %202 = vector.shape_cast %201 : vector<1x16x32xf32> to vector<16x32xf32>
    %cst_98 = arith.constant dense<0.000000e+00> : vector<16x64xf32>
    %203 = tpu.matmul %202, %198, %cst_98 {dimension_numbers = #tpu.dot_dimension_numbers<[1], [0], [0], [1], [0, 0, 1, 1], [], []>} : vector<16x32xf32>, vector<32x64xf32>, vector<16x64xf32> -> vector<16x64xf32>
    %204 = arith.addf %203, %43 : vector<16x64xf32>
    %cst_99 = arith.constant dense<0xFF800000> : vector<16xf32>
    %205 = vector.multi_reduction <maximumf>, %204, %cst_99 [1] : vector<16x64xf32> to vector<16xf32>
    %206 = vector.shape_cast %205 : vector<16xf32> to vector<16x1xf32>
    %207 = vector.broadcast %206 : vector<16x1xf32> to vector<16x64xf32>
    %208 = arith.subf %204, %207 : vector<16x64xf32>
    %209 = math.exp %208 : vector<16x64xf32>
    %cst_100 = arith.constant dense<0.000000e+00> : vector<16x64xf32>
    %210 = tpu.matmul %209, %31, %cst_100 {dimension_numbers = #tpu.dot_dimension_numbers<[1], [0], [0], [1], [0, 0, 1, 1], [], []>} : vector<16x64xf32>, vector<64x64xf32>, vector<16x64xf32> -> vector<16x64xf32>
    %211 = arith.divf %209, %210 : vector<16x64xf32>
    %cst_101 = arith.constant dense<0.000000e+00> : vector<16x32xf32>
    %212 = tpu.matmul %211, %200, %cst_101 {dimension_numbers = #tpu.dot_dimension_numbers<[1], [0], [0], [1], [0, 0, 1, 1], [], []>} : vector<16x64xf32>, vector<64x32xf32>, vector<16x32xf32> -> vector<16x32xf32>
    %c7_102 = arith.constant 7 : index
    %c0_103 = arith.constant 0 : index
    %c0_104 = arith.constant 0 : index
    %213 = vector.load %arg3[%c7_102, %c0_103, %c0_104] : memref<16x32x32xf32, #tpu.memory_space<vmem>>, vector<1x32x32xf32>
    %214 = vector.shape_cast %213 : vector<1x32x32xf32> to vector<32x32xf32>
    %cst_105 = arith.constant dense<0.000000e+00> : vector<16x32xf32>
    %215 = tpu.matmul %212, %214, %cst_105 {dimension_numbers = #tpu.dot_dimension_numbers<[1], [0], [0], [1], [0, 0, 1, 1], [], []>} : vector<16x32xf32>, vector<32x32xf32>, vector<16x32xf32> -> vector<16x32xf32>
    %216 = arith.addf %0, %215 : vector<16x32xf32>
    %c13 = arith.constant 13 : index
    %c0_106 = arith.constant 0 : index
    %c0_107 = arith.constant 0 : index
    %217 = vector.load %arg4[%c13, %c0_106, %c0_107] : memref<28x1x32xf32, #tpu.memory_space<vmem>>, vector<1x1x32xf32>
    %218 = vector.shape_cast %217 : vector<1x1x32xf32> to vector<1x32xf32>
    %219 = vector.broadcast %218 : vector<1x32xf32> to vector<16x32xf32>
    %220 = arith.addf %216, %219 : vector<16x32xf32>
    %c14 = arith.constant 14 : index
    %c0_108 = arith.constant 0 : index
    %c0_109 = arith.constant 0 : index
    %221 = vector.load %arg4[%c14, %c0_108, %c0_109] : memref<28x1x32xf32, #tpu.memory_space<vmem>>, vector<1x1x32xf32>
    %222 = vector.shape_cast %221 : vector<1x1x32xf32> to vector<1x32xf32>
    %c15 = arith.constant 15 : index
    %c0_110 = arith.constant 0 : index
    %c0_111 = arith.constant 0 : index
    %223 = vector.load %arg4[%c15, %c0_110, %c0_111] : memref<28x1x32xf32, #tpu.memory_space<vmem>>, vector<1x1x32xf32>
    %224 = vector.shape_cast %223 : vector<1x1x32xf32> to vector<1x32xf32>
    %cst_112 = arith.constant dense<0.000000e+00> : vector<16xf32>
    %225 = vector.multi_reduction <add>, %220, %cst_112 [1] : vector<16x32xf32> to vector<16xf32>
    %226 = vector.shape_cast %225 : vector<16xf32> to vector<16x1xf32>
    %cst_113 = arith.constant 3.200000e+01 : f32
    %227 = vector.broadcast %cst_113 : f32 to vector<16x1xf32>
    %228 = arith.divf %226, %227 : vector<16x1xf32>
    %229 = vector.broadcast %228 : vector<16x1xf32> to vector<16x32xf32>
    %230 = arith.subf %220, %229 : vector<16x32xf32>
    %231 = arith.mulf %230, %230 : vector<16x32xf32>
    %cst_114 = arith.constant dense<0.000000e+00> : vector<16xf32>
    %232 = vector.multi_reduction <add>, %231, %cst_114 [1] : vector<16x32xf32> to vector<16xf32>
    %233 = vector.shape_cast %232 : vector<16xf32> to vector<16x1xf32>
    %cst_115 = arith.constant 3.200000e+01 : f32
    %234 = vector.broadcast %cst_115 : f32 to vector<16x1xf32>
    %235 = arith.divf %233, %234 : vector<16x1xf32>
    %236 = vector.broadcast %228 : vector<16x1xf32> to vector<16x32xf32>
    %237 = arith.subf %220, %236 : vector<16x32xf32>
    %cst_116 = arith.constant 9.99999974E-6 : f32
    %238 = vector.broadcast %cst_116 : f32 to vector<16x1xf32>
    %239 = arith.addf %235, %238 : vector<16x1xf32>
    %240 = math.rsqrt %239 : vector<16x1xf32>
    %241 = vector.broadcast %240 : vector<16x1xf32> to vector<16x32xf32>
    %242 = arith.mulf %237, %241 : vector<16x32xf32>
    %243 = vector.broadcast %222 : vector<1x32xf32> to vector<16x32xf32>
    %244 = arith.mulf %242, %243 : vector<16x32xf32>
    %245 = vector.broadcast %224 : vector<1x32xf32> to vector<16x32xf32>
    %246 = arith.addf %244, %245 : vector<16x32xf32>
    %c8_117 = arith.constant 8 : index
    %c0_118 = arith.constant 0 : index
    %c0_119 = arith.constant 0 : index
    %247 = vector.load %arg3[%c8_117, %c0_118, %c0_119] : memref<16x32x32xf32, #tpu.memory_space<vmem>>, vector<1x32x32xf32>
    %248 = vector.shape_cast %247 : vector<1x32x32xf32> to vector<32x32xf32>
    %cst_120 = arith.constant dense<0.000000e+00> : vector<16x32xf32>
    %249 = tpu.matmul %246, %248, %cst_120 {dimension_numbers = #tpu.dot_dimension_numbers<[1], [0], [0], [1], [0, 0, 1, 1], [], []>} : vector<16x32xf32>, vector<32x32xf32>, vector<16x32xf32> -> vector<16x32xf32>
    %c16 = arith.constant 16 : index
    %c0_121 = arith.constant 0 : index
    %c0_122 = arith.constant 0 : index
    %250 = vector.load %arg4[%c16, %c0_121, %c0_122] : memref<28x1x32xf32, #tpu.memory_space<vmem>>, vector<1x1x32xf32>
    %251 = vector.shape_cast %250 : vector<1x1x32xf32> to vector<1x32xf32>
    %252 = vector.broadcast %251 : vector<1x32xf32> to vector<16x32xf32>
    %253 = arith.addf %249, %252 : vector<16x32xf32>
    %cst_123 = arith.constant -1.702000e+00 : f32
    %254 = vector.broadcast %cst_123 : f32 to vector<16x32xf32>
    %255 = arith.mulf %254, %253 : vector<16x32xf32>
    %256 = math.exp %255 : vector<16x32xf32>
    %cst_124 = arith.constant 1.000000e+00 : f32
    %257 = vector.broadcast %cst_124 : f32 to vector<16x32xf32>
    %258 = arith.addf %257, %256 : vector<16x32xf32>
    %259 = arith.divf %253, %258 : vector<16x32xf32>
    %c9_125 = arith.constant 9 : index
    %c0_126 = arith.constant 0 : index
    %c0_127 = arith.constant 0 : index
    %260 = vector.load %arg3[%c9_125, %c0_126, %c0_127] : memref<16x32x32xf32, #tpu.memory_space<vmem>>, vector<1x32x32xf32>
    %261 = vector.shape_cast %260 : vector<1x32x32xf32> to vector<32x32xf32>
    %cst_128 = arith.constant dense<0.000000e+00> : vector<16x32xf32>
    %262 = tpu.matmul %259, %261, %cst_128 {dimension_numbers = #tpu.dot_dimension_numbers<[1], [0], [0], [1], [0, 0, 1, 1], [], []>} : vector<16x32xf32>, vector<32x32xf32>, vector<16x32xf32> -> vector<16x32xf32>
    %263 = arith.addf %220, %262 : vector<16x32xf32>
    %c17 = arith.constant 17 : index
    %c0_129 = arith.constant 0 : index
    %c0_130 = arith.constant 0 : index
    %264 = vector.load %arg4[%c17, %c0_129, %c0_130] : memref<28x1x32xf32, #tpu.memory_space<vmem>>, vector<1x1x32xf32>
    %265 = vector.shape_cast %264 : vector<1x1x32xf32> to vector<1x32xf32>
    %266 = vector.broadcast %265 : vector<1x32xf32> to vector<16x32xf32>
    %267 = arith.addf %263, %266 : vector<16x32xf32>
    %c18 = arith.constant 18 : index
    %c0_131 = arith.constant 0 : index
    %c0_132 = arith.constant 0 : index
    %268 = vector.load %arg4[%c18, %c0_131, %c0_132] : memref<28x1x32xf32, #tpu.memory_space<vmem>>, vector<1x1x32xf32>
    %269 = vector.shape_cast %268 : vector<1x1x32xf32> to vector<1x32xf32>
    %c19 = arith.constant 19 : index
    %c0_133 = arith.constant 0 : index
    %c0_134 = arith.constant 0 : index
    %270 = vector.load %arg4[%c19, %c0_133, %c0_134] : memref<28x1x32xf32, #tpu.memory_space<vmem>>, vector<1x1x32xf32>
    %271 = vector.shape_cast %270 : vector<1x1x32xf32> to vector<1x32xf32>
    %cst_135 = arith.constant dense<0.000000e+00> : vector<16xf32>
    %272 = vector.multi_reduction <add>, %267, %cst_135 [1] : vector<16x32xf32> to vector<16xf32>
    %273 = vector.shape_cast %272 : vector<16xf32> to vector<16x1xf32>
    %cst_136 = arith.constant 3.200000e+01 : f32
    %274 = vector.broadcast %cst_136 : f32 to vector<16x1xf32>
    %275 = arith.divf %273, %274 : vector<16x1xf32>
    %276 = vector.broadcast %275 : vector<16x1xf32> to vector<16x32xf32>
    %277 = arith.subf %267, %276 : vector<16x32xf32>
    %278 = arith.mulf %277, %277 : vector<16x32xf32>
    %cst_137 = arith.constant dense<0.000000e+00> : vector<16xf32>
    %279 = vector.multi_reduction <add>, %278, %cst_137 [1] : vector<16x32xf32> to vector<16xf32>
    %280 = vector.shape_cast %279 : vector<16xf32> to vector<16x1xf32>
    %cst_138 = arith.constant 3.200000e+01 : f32
    %281 = vector.broadcast %cst_138 : f32 to vector<16x1xf32>
    %282 = arith.divf %280, %281 : vector<16x1xf32>
    %283 = vector.broadcast %275 : vector<16x1xf32> to vector<16x32xf32>
    %284 = arith.subf %267, %283 : vector<16x32xf32>
    %cst_139 = arith.constant 9.99999974E-6 : f32
    %285 = vector.broadcast %cst_139 : f32 to vector<16x1xf32>
    %286 = arith.addf %282, %285 : vector<16x1xf32>
    %287 = math.rsqrt %286 : vector<16x1xf32>
    %288 = vector.broadcast %287 : vector<16x1xf32> to vector<16x32xf32>
    %289 = arith.mulf %284, %288 : vector<16x32xf32>
    %290 = vector.broadcast %269 : vector<1x32xf32> to vector<16x32xf32>
    %291 = arith.mulf %289, %290 : vector<16x32xf32>
    %292 = vector.broadcast %271 : vector<1x32xf32> to vector<16x32xf32>
    %293 = arith.addf %291, %292 : vector<16x32xf32>
    %c10_140 = arith.constant 10 : index
    %c0_141 = arith.constant 0 : index
    %c0_142 = arith.constant 0 : index
    %294 = vector.load %arg3[%c10_140, %c0_141, %c0_142] : memref<16x32x32xf32, #tpu.memory_space<vmem>>, vector<1x32x32xf32>
    %295 = vector.shape_cast %294 : vector<1x32x32xf32> to vector<32x32xf32>
    %cst_143 = arith.constant dense<0.000000e+00> : vector<16x32xf32>
    %296 = tpu.matmul %293, %295, %cst_143 {dimension_numbers = #tpu.dot_dimension_numbers<[1], [0], [0], [1], [0, 0, 1, 1], [], []>} : vector<16x32xf32>, vector<32x32xf32>, vector<16x32xf32> -> vector<16x32xf32>
    %c20 = arith.constant 20 : index
    %c0_144 = arith.constant 0 : index
    %c0_145 = arith.constant 0 : index
    %297 = vector.load %arg4[%c20, %c0_144, %c0_145] : memref<28x1x32xf32, #tpu.memory_space<vmem>>, vector<1x1x32xf32>
    %298 = vector.shape_cast %297 : vector<1x1x32xf32> to vector<1x32xf32>
    %299 = vector.broadcast %298 : vector<1x32xf32> to vector<16x32xf32>
    %300 = arith.addf %296, %299 : vector<16x32xf32>
    %c11_146 = arith.constant 11 : index
    %c0_147 = arith.constant 0 : index
    %c0_148 = arith.constant 0 : index
    %301 = vector.load %arg3[%c11_146, %c0_147, %c0_148] : memref<16x32x32xf32, #tpu.memory_space<vmem>>, vector<1x32x32xf32>
    %302 = vector.shape_cast %301 : vector<1x32x32xf32> to vector<32x32xf32>
    %cst_149 = arith.constant dense<0.000000e+00> : vector<16x32xf32>
    %303 = tpu.matmul %293, %302, %cst_149 {dimension_numbers = #tpu.dot_dimension_numbers<[1], [0], [0], [1], [0, 0, 1, 1], [], []>} : vector<16x32xf32>, vector<32x32xf32>, vector<16x32xf32> -> vector<16x32xf32>
    %c21 = arith.constant 21 : index
    %c0_150 = arith.constant 0 : index
    %c0_151 = arith.constant 0 : index
    %304 = vector.load %arg4[%c21, %c0_150, %c0_151] : memref<28x1x32xf32, #tpu.memory_space<vmem>>, vector<1x1x32xf32>
    %305 = vector.shape_cast %304 : vector<1x1x32xf32> to vector<1x32xf32>
    %306 = vector.broadcast %305 : vector<1x32xf32> to vector<16x32xf32>
    %307 = arith.addf %303, %306 : vector<16x32xf32>
    %308 = tpu.transpose %300, [1, 0] : vector<16x32xf32> -> vector<32x16xf32>
    %309 = tpu.concatenate %308, %308, %308, %308 in 1 : vector<32x16xf32>, vector<32x16xf32>, vector<32x16xf32>, vector<32x16xf32> -> vector<32x64xf32>
    %310 = arith.mulf %309, %11 : vector<32x64xf32>
    %311 = tpu.concatenate %307, %307, %307, %307 in 0 : vector<16x32xf32>, vector<16x32xf32>, vector<16x32xf32>, vector<16x32xf32> -> vector<64x32xf32>
    %312 = arith.mulf %311, %21 : vector<64x32xf32>
    %c2_152 = arith.constant 2 : index
    %c0_153 = arith.constant 0 : index
    %c0_154 = arith.constant 0 : index
    %313 = vector.load %arg0[%c2_152, %c0_153, %c0_154] : memref<3x16x32xf32, #tpu.memory_space<vmem>>, vector<1x16x32xf32>
    %314 = vector.shape_cast %313 : vector<1x16x32xf32> to vector<16x32xf32>
    %cst_155 = arith.constant dense<0.000000e+00> : vector<16x64xf32>
    %315 = tpu.matmul %314, %310, %cst_155 {dimension_numbers = #tpu.dot_dimension_numbers<[1], [0], [0], [1], [0, 0, 1, 1], [], []>} : vector<16x32xf32>, vector<32x64xf32>, vector<16x64xf32> -> vector<16x64xf32>
    %316 = arith.addf %315, %43 : vector<16x64xf32>
    %cst_156 = arith.constant dense<0xFF800000> : vector<16xf32>
    %317 = vector.multi_reduction <maximumf>, %316, %cst_156 [1] : vector<16x64xf32> to vector<16xf32>
    %318 = vector.shape_cast %317 : vector<16xf32> to vector<16x1xf32>
    %319 = vector.broadcast %318 : vector<16x1xf32> to vector<16x64xf32>
    %320 = arith.subf %316, %319 : vector<16x64xf32>
    %321 = math.exp %320 : vector<16x64xf32>
    %cst_157 = arith.constant dense<0.000000e+00> : vector<16x64xf32>
    %322 = tpu.matmul %321, %31, %cst_157 {dimension_numbers = #tpu.dot_dimension_numbers<[1], [0], [0], [1], [0, 0, 1, 1], [], []>} : vector<16x64xf32>, vector<64x64xf32>, vector<16x64xf32> -> vector<16x64xf32>
    %323 = arith.divf %321, %322 : vector<16x64xf32>
    %cst_158 = arith.constant dense<0.000000e+00> : vector<16x32xf32>
    %324 = tpu.matmul %323, %312, %cst_158 {dimension_numbers = #tpu.dot_dimension_numbers<[1], [0], [0], [1], [0, 0, 1, 1], [], []>} : vector<16x64xf32>, vector<64x32xf32>, vector<16x32xf32> -> vector<16x32xf32>
    %c12_159 = arith.constant 12 : index
    %c0_160 = arith.constant 0 : index
    %c0_161 = arith.constant 0 : index
    %325 = vector.load %arg3[%c12_159, %c0_160, %c0_161] : memref<16x32x32xf32, #tpu.memory_space<vmem>>, vector<1x32x32xf32>
    %326 = vector.shape_cast %325 : vector<1x32x32xf32> to vector<32x32xf32>
    %cst_162 = arith.constant dense<0.000000e+00> : vector<16x32xf32>
    %327 = tpu.matmul %324, %326, %cst_162 {dimension_numbers = #tpu.dot_dimension_numbers<[1], [0], [0], [1], [0, 0, 1, 1], [], []>} : vector<16x32xf32>, vector<32x32xf32>, vector<16x32xf32> -> vector<16x32xf32>
    %328 = arith.addf %0, %327 : vector<16x32xf32>
    %c22 = arith.constant 22 : index
    %c0_163 = arith.constant 0 : index
    %c0_164 = arith.constant 0 : index
    %329 = vector.load %arg4[%c22, %c0_163, %c0_164] : memref<28x1x32xf32, #tpu.memory_space<vmem>>, vector<1x1x32xf32>
    %330 = vector.shape_cast %329 : vector<1x1x32xf32> to vector<1x32xf32>
    %331 = vector.broadcast %330 : vector<1x32xf32> to vector<16x32xf32>
    %332 = arith.addf %328, %331 : vector<16x32xf32>
    %c23 = arith.constant 23 : index
    %c0_165 = arith.constant 0 : index
    %c0_166 = arith.constant 0 : index
    %333 = vector.load %arg4[%c23, %c0_165, %c0_166] : memref<28x1x32xf32, #tpu.memory_space<vmem>>, vector<1x1x32xf32>
    %334 = vector.shape_cast %333 : vector<1x1x32xf32> to vector<1x32xf32>
    %c24 = arith.constant 24 : index
    %c0_167 = arith.constant 0 : index
    %c0_168 = arith.constant 0 : index
    %335 = vector.load %arg4[%c24, %c0_167, %c0_168] : memref<28x1x32xf32, #tpu.memory_space<vmem>>, vector<1x1x32xf32>
    %336 = vector.shape_cast %335 : vector<1x1x32xf32> to vector<1x32xf32>
    %cst_169 = arith.constant dense<0.000000e+00> : vector<16xf32>
    %337 = vector.multi_reduction <add>, %332, %cst_169 [1] : vector<16x32xf32> to vector<16xf32>
    %338 = vector.shape_cast %337 : vector<16xf32> to vector<16x1xf32>
    %cst_170 = arith.constant 3.200000e+01 : f32
    %339 = vector.broadcast %cst_170 : f32 to vector<16x1xf32>
    %340 = arith.divf %338, %339 : vector<16x1xf32>
    %341 = vector.broadcast %340 : vector<16x1xf32> to vector<16x32xf32>
    %342 = arith.subf %332, %341 : vector<16x32xf32>
    %343 = arith.mulf %342, %342 : vector<16x32xf32>
    %cst_171 = arith.constant dense<0.000000e+00> : vector<16xf32>
    %344 = vector.multi_reduction <add>, %343, %cst_171 [1] : vector<16x32xf32> to vector<16xf32>
    %345 = vector.shape_cast %344 : vector<16xf32> to vector<16x1xf32>
    %cst_172 = arith.constant 3.200000e+01 : f32
    %346 = vector.broadcast %cst_172 : f32 to vector<16x1xf32>
    %347 = arith.divf %345, %346 : vector<16x1xf32>
    %348 = vector.broadcast %340 : vector<16x1xf32> to vector<16x32xf32>
    %349 = arith.subf %332, %348 : vector<16x32xf32>
    %cst_173 = arith.constant 9.99999974E-6 : f32
    %350 = vector.broadcast %cst_173 : f32 to vector<16x1xf32>
    %351 = arith.addf %347, %350 : vector<16x1xf32>
    %352 = math.rsqrt %351 : vector<16x1xf32>
    %353 = vector.broadcast %352 : vector<16x1xf32> to vector<16x32xf32>
    %354 = arith.mulf %349, %353 : vector<16x32xf32>
    %355 = vector.broadcast %334 : vector<1x32xf32> to vector<16x32xf32>
    %356 = arith.mulf %354, %355 : vector<16x32xf32>
    %357 = vector.broadcast %336 : vector<1x32xf32> to vector<16x32xf32>
    %358 = arith.addf %356, %357 : vector<16x32xf32>
    %c13_174 = arith.constant 13 : index
    %c0_175 = arith.constant 0 : index
    %c0_176 = arith.constant 0 : index
    %359 = vector.load %arg3[%c13_174, %c0_175, %c0_176] : memref<16x32x32xf32, #tpu.memory_space<vmem>>, vector<1x32x32xf32>
    %360 = vector.shape_cast %359 : vector<1x32x32xf32> to vector<32x32xf32>
    %cst_177 = arith.constant dense<0.000000e+00> : vector<16x32xf32>
    %361 = tpu.matmul %358, %360, %cst_177 {dimension_numbers = #tpu.dot_dimension_numbers<[1], [0], [0], [1], [0, 0, 1, 1], [], []>} : vector<16x32xf32>, vector<32x32xf32>, vector<16x32xf32> -> vector<16x32xf32>
    %c25 = arith.constant 25 : index
    %c0_178 = arith.constant 0 : index
    %c0_179 = arith.constant 0 : index
    %362 = vector.load %arg4[%c25, %c0_178, %c0_179] : memref<28x1x32xf32, #tpu.memory_space<vmem>>, vector<1x1x32xf32>
    %363 = vector.shape_cast %362 : vector<1x1x32xf32> to vector<1x32xf32>
    %364 = vector.broadcast %363 : vector<1x32xf32> to vector<16x32xf32>
    %365 = arith.addf %361, %364 : vector<16x32xf32>
    %cst_180 = arith.constant -1.702000e+00 : f32
    %366 = vector.broadcast %cst_180 : f32 to vector<16x32xf32>
    %367 = arith.mulf %366, %365 : vector<16x32xf32>
    %368 = math.exp %367 : vector<16x32xf32>
    %cst_181 = arith.constant 1.000000e+00 : f32
    %369 = vector.broadcast %cst_181 : f32 to vector<16x32xf32>
    %370 = arith.addf %369, %368 : vector<16x32xf32>
    %371 = arith.divf %365, %370 : vector<16x32xf32>
    %c14_182 = arith.constant 14 : index
    %c0_183 = arith.constant 0 : index
    %c0_184 = arith.constant 0 : index
    %372 = vector.load %arg3[%c14_182, %c0_183, %c0_184] : memref<16x32x32xf32, #tpu.memory_space<vmem>>, vector<1x32x32xf32>
    %373 = vector.shape_cast %372 : vector<1x32x32xf32> to vector<32x32xf32>
    %cst_185 = arith.constant dense<0.000000e+00> : vector<16x32xf32>
    %374 = tpu.matmul %371, %373, %cst_185 {dimension_numbers = #tpu.dot_dimension_numbers<[1], [0], [0], [1], [0, 0, 1, 1], [], []>} : vector<16x32xf32>, vector<32x32xf32>, vector<16x32xf32> -> vector<16x32xf32>
    %375 = arith.addf %332, %374 : vector<16x32xf32>
    %c26 = arith.constant 26 : index
    %c0_186 = arith.constant 0 : index
    %c0_187 = arith.constant 0 : index
    %376 = vector.load %arg4[%c26, %c0_186, %c0_187] : memref<28x1x32xf32, #tpu.memory_space<vmem>>, vector<1x1x32xf32>
    %377 = vector.shape_cast %376 : vector<1x1x32xf32> to vector<1x32xf32>
    %378 = vector.broadcast %377 : vector<1x32xf32> to vector<16x32xf32>
    %379 = arith.addf %375, %378 : vector<16x32xf32>
    %c15_188 = arith.constant 15 : index
    %c0_189 = arith.constant 0 : index
    %c0_190 = arith.constant 0 : index
    %380 = vector.load %arg3[%c15_188, %c0_189, %c0_190] : memref<16x32x32xf32, #tpu.memory_space<vmem>>, vector<1x32x32xf32>
    %381 = vector.shape_cast %380 : vector<1x32x32xf32> to vector<32x32xf32>
    %cst_191 = arith.constant dense<0.000000e+00> : vector<16x32xf32>
    %382 = tpu.matmul %379, %381, %cst_191 {dimension_numbers = #tpu.dot_dimension_numbers<[1], [0], [0], [1], [0, 0, 1, 1], [], []>} : vector<16x32xf32>, vector<32x32xf32>, vector<16x32xf32> -> vector<16x32xf32>
    %c27 = arith.constant 27 : index
    %c0_192 = arith.constant 0 : index
    %c0_193 = arith.constant 0 : index
    %383 = vector.load %arg4[%c27, %c0_192, %c0_193] : memref<28x1x32xf32, #tpu.memory_space<vmem>>, vector<1x1x32xf32>
    %384 = vector.shape_cast %383 : vector<1x1x32xf32> to vector<1x32xf32>
    %385 = vector.broadcast %384 : vector<1x32xf32> to vector<16x32xf32>
    %386 = arith.addf %382, %385 : vector<16x32xf32>
    %c0_194 = arith.constant 0 : index
    %c0_195 = arith.constant 0 : index
    %387 = vector.load %arg5[%c0_194, %c0_195] : memref<16x32xf32, #tpu.memory_space<vmem>>, vector<16x32xf32>
    tpu.vector_store %arg5[%c0_194, %c0_195], %386 {strides = array<i32>} : memref<16x32xf32, #tpu.memory_space<vmem>>, vector<16x32xf32>,
    return
  }
}

</mosaic_0001>

<bundles_post_ra>
// kernel: transformer_decoder_forward.1
= control target key start
LH: loop header
LB: loop body
LE: loop exit
PB: predicated region body
PF: predicated region fallthrough
CT: control target
= control target key end

     0   :  { %10 = vsyncpa [#allocation3], 0  ;;  %s4732_s0 = inlined_call_operand.hbm [shape: f32[3,16,32], index: 0, kind: input, shape index: {}]   ;;  %s4733_s1 = inlined_call_operand.hbm [shape: f32[16,32], index: 1, kind: input, shape index: {}]   ;;  %s4734_s2 = inlined_call_operand.hbm [shape: f32[16,32], index: 2, kind: input, shape index: {}]   ;;  %s4735_s3 = inlined_call_operand.hbm [shape: f32[16,32,32], index: 3, kind: input, shape index: {}]   ;;  %s4736_s4 = inlined_call_operand.hbm [shape: f32[28,1,32], index: 4, kind: input, shape index: {}]   ;;  %s4737_s5 = inlined_call_operand.vmem [shape: f32[16,32], index: 5, kind: output, shape index: {}]  }
   0x1   :  { %11 = vsyncpa [#allocation5], 0 }
   0x2   :  { %12 = vsyncpa [#allocation8], 0  ;;  %s4120_s18 = smov [#allocation4]   ;;  %s4121_s20 = smov [#allocation7]  }
   0x3   :  { %s30_s19 = sshll.u32 %s4120_s18, 4  ;;  %s54_s21 = sshll.u32 %s4121_s20, 4  ;;  %s31_s19 = int_to_ptr.vmem [resolvable:$true] %s30_s19  ;;  %s4164_s21 = int_to_ptr.vmem [resolvable:$true] %s54_s21 }
   0x4   :  { %s4004_s24 = scalar_lea.hbm %s4733_s1, 256 }
   0x5   :  { %p4005_p0 = scmp.ne.s32.totalorder %s4733_s1, %s4004_s24  ;;  %p4008_p1 = scmp.lt.u32.totalorder %s4004_s24, %s4733_s1 }
   0x7   :  { %p4010_p2 = pnand %p4008_p1, %p4005_p0 }
   0x9   :  { %4013 = shalt.err (!%p4010_p2)
}
   0xa   :  { %s4014_s29 = scalar_lea.vmem %s31_s19, 256  ;;  %p4019_p4 = scmp.lt.s32.totalorder %s31_s19, %s31_s19 }
   0xb   :  { %p4015_p3 = scmp.ne.s32.totalorder %s31_s19, %s4014_s29  ;;  %p4020_p5 = scmp.lt.s32.totalorder %s4014_s29, %s4014_s29 }
   0xd   :  { %p4021_p6 = por %p4020_p5, %p4019_p4 }
   0xf   :  { %p4022_p7 = pnand %p4021_p6, %p4015_p3 }
  0x11   :  { %4025 = shalt.err (!%p4022_p7)
}
  0x12   :  { %s4122_s30 = smov 128   ;;  %s4123_s6 = smov 8  }
  0x13   :  { %36 = dma.hbm_to_vmem [thread:$0]  %s4733_s1, 256, %s31_s19, [#allocation5], %s4122_s30, %s4122_s30, %s4123_s6  }
  0x14   :  { %s4026_s11 = scalar_lea.hbm %s4735_s3, 8192 }
  0x15   :  { %p4027_p8 = scmp.ne.s32.totalorder %s4735_s3, %s4026_s11  ;;  %p4030_p9 = scmp.lt.u32.totalorder %s4026_s11, %s4735_s3 }
  0x17   :  { %p4032_p10 = pnand %p4030_p9, %p4027_p8 }
  0x19   :  { %4035 = shalt.err (!%p4032_p10)
}
  0x1a   :  { %s4036_s16 = scalar_lea.vmem %s4164_s21, 8192  ;;  %p4041_p12 = scmp.lt.s32.totalorder %s4164_s21, %s4164_s21 }
  0x1b   :  { %p4037_p11 = scmp.ne.s32.totalorder %s4164_s21, %s4036_s16  ;;  %p4042_p13 = scmp.lt.s32.totalorder %s4036_s16, %s4036_s16 }
  0x1d   :  { %p4043_p0 = por %p4042_p13, %p4041_p12 }
  0x1f   :  { %p4044_p1 = pnand %p4043_p0, %p4037_p11 }
  0x21   :  { %4047 = shalt.err (!%p4044_p1)
}
  0x22   :  { %60 = dma.hbm_to_vmem [thread:$0]  %s4735_s3, 8192, %s4164_s21, [#allocation8], %s4122_s30, %s4122_s30, %s4123_s6  }
  0x23   :  { %s4124_s18 = smov [#allocation2]   ;;  %s4125_s20 = smov [#allocation6]  }
  0x24   :  { %s18_s19 = sshll.u32 %s4124_s18, 4  ;;  %s42_s22 = sshll.u32 %s4125_s20, 4  ;;  %s19_s19 = int_to_ptr.vmem [resolvable:$true] %s18_s19  ;;  %s4201_s22 = int_to_ptr.vmem [resolvable:$true] %s42_s22 }
  0x25   :  { %s4048_s25 = scalar_lea.hbm %s4732_s0, 768 }
  0x26   :  { %p4049_p2 = scmp.ne.s32.totalorder %s4732_s0, %s4048_s25  ;;  %p4052_p3 = scmp.lt.u32.totalorder %s4048_s25, %s4732_s0 }
  0x28   :  { %p4054_p4 = pnand %p4052_p3, %p4049_p2 }
  0x2a   :  { %4057 = shalt.err (!%p4054_p4)
}
  0x2b   :  { %s4058_s3 = scalar_lea.vmem %s19_s19, 768  ;;  %p4063_p6 = scmp.lt.s32.totalorder %s19_s19, %s19_s19 }
  0x2c   :  { %p4059_p5 = scmp.ne.s32.totalorder %s19_s19, %s4058_s3  ;;  %p4064_p7 = scmp.lt.s32.totalorder %s4058_s3, %s4058_s3 }
  0x2e   :  { %p4065_p8 = por %p4064_p7, %p4063_p6 }
  0x30   :  { %p4066_p9 = pnand %p4065_p8, %p4059_p5 }
  0x32   :  { %4069 = shalt.err (!%p4066_p9)
}
  0x33   :  { %24 = dma.hbm_to_vmem [thread:$0]  %s4732_s0, 768, %s19_s19, [#allocation3], %s4122_s30, %s4122_s30, %s4123_s6  }
  0x34   :  { %s4070_s10 = scalar_lea.hbm %s4734_s2, 256 }
  0x35   :  { %p4071_p10 = scmp.ne.s32.totalorder %s4734_s2, %s4070_s10  ;;  %p4074_p11 = scmp.lt.u32.totalorder %s4070_s10, %s4734_s2 }
  0x37   :  { %p4076_p12 = pnand %p4074_p11, %p4071_p10 }
  0x39   :  { %4079 = shalt.err (!%p4076_p12)
}
  0x3a   :  { %s4080_s15 = scalar_lea.vmem %s4201_s22, 256  ;;  %p4085_p0 = scmp.lt.s32.totalorder %s4201_s22, %s4201_s22 }
  0x3b   :  { %p4081_p13 = scmp.ne.s32.totalorder %s4201_s22, %s4080_s15  ;;  %p4086_p1 = scmp.lt.s32.totalorder %s4080_s15, %s4080_s15 }
  0x3d   :  { %p4087_p2 = por %p4086_p1, %p4085_p0 }
  0x3f   :  { %p4088_p3 = pnand %p4087_p2, %p4081_p13 }
  0x41   :  { %4091 = shalt.err (!%p4088_p3)
}
  0x42   :  { %48 = dma.hbm_to_vmem [thread:$0]  %s4734_s2, 256, %s4201_s22, [#allocation5], %s4122_s30, %s4122_s30, %s4123_s6  }
  0x43   :  { %s4126_s1 = smov [#allocation9]   ;;  %s4092_s20 = scalar_lea.hbm %s4736_s4, 448 }
  0x44   :  { %s66_s17 = sshll.u32 %s4126_s1, 4  ;;  %p4093_p4 = scmp.ne.s32.totalorder %s4736_s4, %s4092_s20  ;;  %s67_s17 = int_to_ptr.vmem [resolvable:$true] %s66_s17 }
  0x45   :  { %p4096_p5 = scmp.lt.u32.totalorder %s4092_s20, %s4736_s4 }
  0x47   :  { %p4098_p6 = pnand %p4096_p5, %p4093_p4 }
  0x49   :  { %4101 = shalt.err (!%p4098_p6)
}
  0x4a   :  { %s4102_s27 = scalar_lea.vmem %s67_s17, 448  ;;  %p4107_p8 = scmp.lt.s32.totalorder %s67_s17, %s67_s17 }
  0x4b   :  { %p4103_p7 = scmp.ne.s32.totalorder %s67_s17, %s4102_s27  ;;  %p4108_p9 = scmp.lt.s32.totalorder %s4102_s27, %s4102_s27 }
  0x4d   :  { %p4109_p10 = por %p4108_p9, %p4107_p8 }
  0x4f   :  { %p4110_p11 = pnand %p4109_p10, %p4103_p7 }
  0x51   :  { %4113 = shalt.err (!%p4110_p11)
}
  0x52   :  { %s4127_s2 = smov 16   ;;  %s4128_s30 = smov 1  }
  0x53   :  { %72 = dma.hbm_to_vmem [thread:$0]  %s4736_s4, 448, %s67_s17, [#allocation8], %s4127_s2, %s4127_s2, %s4128_s30  }
  0x54   :  { %4114 = dma.done.wait [#allocation3], 768  }
  0x55   :  { %4115 = vsyncadd [#allocation3], 4294966528 }
  0x56   :  { %4116 = dma.done.wait [#allocation5], 512  }
  0x57   :  { %4117 = vsyncadd [#allocation5], 4294966784 }
  0x58   :  { %4118 = dma.done.wait [#allocation8], 8640  }
  0x59   :  { %4119 = vsyncadd [#allocation8], 4294958656  ;;  %vm165_vm0 = vcmask 261120   ;;  %v90_v0 = vld [vmem:[#allocation6] sm:$0xff]  ;;  %v91_v1 = vld [vmem:[#allocation6 + $0x8] sm:$0xff]  ;;  %v92_v42 = vlaneseq  ;;  %v4129_v63 = vmov 0.0  }
  0x5a   :  { %v166_v2 = vsel %vm165_vm0, %v90_v0, 0.0  ;;  %v169_v3 = vsel %vm165_vm0, %v91_v1, 0.0  ;;  %v209_v14 = vld [vmem:[#allocation7] sm:$0xff]  ;;  %v210_v15 = vld [vmem:[#allocation7 + $0x8] sm:$0xff]  ;;  %v211_v19 = vld [vmem:[#allocation7 + $0x10] sm:$0xff]  ;;  %s4130_s4 = smov 32  }
  0x5b   :  { %167 = vadd.xlane.f32.xlu0 %v166_v2  ;;  %v303_v16 = vld [vmem:[#allocation7 + $0x20] sm:$0xff]  ;;  %v3668_v17 = vpack.c.bf16 %v210_v15, %v209_v14  ;;  %v304_v18 = vld [vmem:[#allocation7 + $0x28] sm:$0xff]  ;;  %v212_v20 = vld [vmem:[#allocation7 + $0x18] sm:$0xff]  ;;  %v4260_v43 = vshrl.u32 %v92_v42, 7  ;;  %v4262_v44 = vand.u32 127, %v92_v42  ;;  %s4131_s28 = smov 48  }
  0x5c   :  { %v3676_v21 = vpack.c.bf16 %v304_v18, %v303_v16  ;;  %v3672_v22 = vpack.c.bf16 %v212_v20, %v211_v19  ;;  %v305_v23 = vld [vmem:[#allocation7 + $0x30] sm:$0xff]  ;;  %v306_v24 = vld [vmem:[#allocation7 + $0x38] sm:$0xff]  ;;  %v3069_v33 = vld [vmem:[#allocation9] ss:$0 sm:$0xff]  ;;  %vm462_vm9 = vcmask 130048   ;;  %vm471_vm11 = vcmask 392192  }
  0x5d   :  { %3669 = vmatprep.subr.bf16.mxu0 %v3668_v17  ;;  %v3680_v25 = vpack.c.bf16 %v306_v24, %v305_v23  ;;  %v3070_v35 = vld [vmem:[#allocation9 + $0x1] ss:$0 sm:$0xff]  ;;  %v4265_v45 = vadd.s32 8, %v4260_v43  ;;  %v4268_v46 = vadd.s32 24, %v4260_v43  ;;  %v4271_v47 = vadd.s32 40, %v4260_v43 }
  0x5e   :  { %3677 = vmatprep.subr.bf16.mxu1 %v3676_v21  ;;  %3671 = vmatpush3.bf16.msra.mxu0 %v3668_v17  ;;  %v4274_v48 = vadd.s32 56, %v4260_v43  ;;  %v4277_v49 = vadd.s32 16, %v4260_v43  ;;  %v4280_v50 = vadd.s32 32, %v4260_v43  ;;  %v4283_v51 = vadd.s32 48, %v4260_v43  ;;  %v3074_v61 = vld [vmem:[#allocation9 + $0x3] ss:$0 sm:$0xff] }
  0x5f   :  { %170 = vadd.xlane.f32.xlu0 %v169_v3  ;;  %3679 = vmatpush3.bf16.msra.mxu1 %v3676_v21  ;;  %v117_v52 = vshra.s32 %v4265_v45, 4  ;;  %v4287_v53 = vshra.s32 %v4262_v44, 3  ;;  %v116_v54 = vshra.s32 %v4260_v43, 4  ;;  %v119_v55 = vshra.s32 %v4268_v46, 4  ;;  %v3071_v62 = vld [vmem:[#allocation9 + $0x2] ss:$0 sm:$0xff] }
  0x60   :  { %3673 = vmatprep.subr.bf16.mxu0 %v3672_v22  ;;  %3681 = vmatprep.subr.bf16.mxu1 %v3680_v25  ;;  %v121_v56 = vshra.s32 %v4271_v47, 4  ;;  %v123_v57 = vshra.s32 %v4274_v48, 4  ;;  %v118_v58 = vshra.s32 %v4277_v49, 4  ;;  %v120_v59 = vshra.s32 %v4280_v50, 4 }
  0x61   :  { %v122_v60 = vshra.s32 %v4283_v51, 4  ;;  %vm126_vm1 = vcmp.eq.s32.totalorder %v117_v52, %v4287_v53  ;;  %vm125_vm2 = vcmp.eq.s32.totalorder %v116_v54, %v4287_v53  ;;  %vm128_vm3 = vcmp.eq.s32.totalorder %v119_v55, %v4287_v53 }
  0x62   :  { %3675 = vmatpush3.bf16.msra.mxu0 %v3672_v22  ;;  %vm130_vm4 = vcmp.eq.s32.totalorder %v121_v56, %v4287_v53  ;;  %vm132_vm5 = vcmp.eq.s32.totalorder %v123_v57, %v4287_v53  ;;  %vm127_vm6 = vcmp.eq.s32.totalorder %v118_v58, %v4287_v53  ;;  %vm129_vm7 = vcmp.eq.s32.totalorder %v120_v59, %v4287_v53 }
  0x63   :  { %3683 = vmatpush3.bf16.msra.mxu1 %v3680_v25  ;;  %vm131_vm8 = vcmp.eq.s32.totalorder %v122_v60, %v4287_v53  ;;  %v4324_v3 = vsel %vm125_vm2, 1.0, %v4129_v63  ;;  %vm571_vm2 = vcmask 523264  }
  0xe8   :  { %v168_v4 = vpop.xlane.xlu0 %167 }
  0xe9   :  { %v173_v5 = vmul.f32 0.03125, %v168_v4  ;;  %v4327_v4 = vsel %vm128_vm3, 1.0, %v4129_v63 }
  0xeb   :  { %v175_v6 = vsub.f32 %v90_v0, %v173_v5  ;;  %v4321_v0 = vsel %vm126_vm1, 1.0, %v4129_v63  ;;  %v4330_v5 = vsel %vm130_vm4, 1.0, %v4129_v63 }
  0xec   :  { %v171_v7 = vpop.xlane.xlu0 %170 }
  0xed   :  { %v174_v8 = vmul.f32 0.03125, %v171_v7  ;;  %v177_v9 = vmul.f32 %v175_v6, %v175_v6 }
  0xef   :  { %v176_v10 = vsub.f32 %v91_v1, %v174_v8  ;;  %v179_v11 = vsel %vm165_vm0, %v177_v9, 0.0 }
  0xf0   :  { %180 = vadd.xlane.f32.xlu1 %v179_v11  ;;  %v4339_v11 = vsel %vm129_vm7, 1.0, %v4129_v63 }
  0xf1   :  { %v178_v12 = vmul.f32 %v176_v10, %v176_v10 }
  0xf3   :  { %v182_v13 = vsel %vm165_vm0, %v178_v12, 0.0  ;;  %v4342_v12 = vsel %vm131_vm8, 1.0, %v4129_v63 }
  0xf4   :  { %183 = vadd.xlane.f32.xlu1 %v182_v13 }
 0x17d   :  { %v181_v26 = vpop.xlane.xlu1 %180 }
 0x17e   :  { %v185_v27 = vmul.f32 0.03125, %v181_v26 }
 0x180   :  { %v187_v28 = vadd.f32 1e-05, %v185_v27 }
 0x181   :  { %v184_v29 = vpop.xlane.xlu1 %183 }
 0x182   :  { %3930 = vrsqrt.f32 %v187_v28  ;;  %v186_v30 = vmul.f32 0.03125, %v184_v29 }
 0x184   :  { %v188_v31 = vadd.f32 1e-05, %v186_v30 }
 0x186   :  { %3932 = vrsqrt.f32 %v188_v31 }
 0x18c   :  { %v3931_v32 = vpop.eup %3930 }
 0x18d   :  { %v191_v34 = vmul.f32 %v3931_v32, %v175_v6  ;;  %v4333_v6 = vsel %vm132_vm5, 1.0, %v4129_v63  ;;  %v488_v32 = vld [vmem:[#allocation2] sm:$0xff] }
 0x18f   :  { %v199_v36 = vmul.f32 %v3069_v33, %v191_v34 }
 0x190   :  { %v3933_v37 = vpop.eup %3932 }
 0x191   :  { %v192_v38 = vmul.f32 %v3933_v37, %v176_v10  ;;  %v207_v39 = vadd.f32 %v3070_v35, %v199_v36  ;;  %v4336_v10 = vsel %vm127_vm6, 1.0, %v4129_v63  ;;  %v97_v36 = vshra.s32 %v4260_v43, 3 }
 0x192   :  { %v4375_v37 = vshra.s32 %v4262_v44, 4 }
 0x193   :  { %v200_v40 = vmul.f32 %v3069_v33, %v192_v38  ;;  %3353 = vmatprep.mubr.msk.f32.mxu0 %vm165_vm0, %v207_v39  ;;  %3364 = vmatprep.mubr.msk.f32.mxu1 %vm165_vm0, %v207_v39  ;;  %v98_v39 = vshra.s32 %v4265_v45, 3 }
 0x194   :  { %vm104_vm10 = vcmp.eq.s32.totalorder %v97_v36, %v4375_v37  ;;  %vm141_vm3 = vcmp.eq.s32.totalorder %v116_v54, %v4375_v37  ;;  %vm142_vm4 = vcmp.eq.s32.totalorder %v117_v52, %v4375_v37  ;;  %vm143_vm6 = vcmp.eq.s32.totalorder %v118_v58, %v4375_v37  ;;  %v753_v58 = vld [vmem:[#allocation7 + $0x50] sm:$0xff] }
 0x195   :  { %v208_v41 = vadd.f32 %v3070_v35, %v200_v40  ;;  %vm105_vm12 = vcmp.eq.s32.totalorder %v98_v39, %v4375_v37  ;;  %vm4436_vm5 = vmpackc.low %vm142_vm4, %vm141_vm3  ;;  %vm144_vm7 = vcmp.eq.s32.totalorder %v119_v55, %v4375_v37 }
 0x196   :  { %vm4452_vm8 = vmpackc.low %vm144_vm7, %vm143_vm6 }
 0x197   :  { %3354 = vmatmul.mubr.msk.f32.vlgmr.msra.gmra.mrb[0].mxu0 %vm165_vm0, %v208_v41  ;;  %3365 = vmatmul.mubr.msk.f32.vlgmr.msra.gmra.mrb[0].mxu1 %vm165_vm0, %v208_v41 }
 0x198   :  { %3375 = vmatprep.mubr.msk.f32.mxu0 %vm165_vm0, %v488_v32 }
 0x26a   :  { %v3355_v1 = vpop.f32.mrb[0].mxu0  ;;  %v3366_v2 = vpop.f32.mrb[0].mxu1 }
 0x26b   :  { %v387_v7 = vadd.f32 %v3366_v2, %v3074_v61  ;;  %v293_v8 = vpop.f32.mrb[1].mxu0  ;;  %v381_v9 = vpop.f32.mrb[1].mxu1  ;;  %v299_v23 = vadd.f32 %v3355_v1, %v3071_v62  ;;  %v4388_v1 = vsel %vm105_vm12, 1.0, %v4129_v63  ;;  %vm146_vm12 = vcmp.eq.s32.totalorder %v121_v56, %v4375_v37  ;;  %v751_v56 = vld [vmem:[#allocation7 + $0x40] sm:$0xff] }
 0x26c   :  { %v294_v13 = vadd.f32 %v3071_v62, %v293_v8  ;;  %v382_v14 = vadd.f32 %v3074_v61, %v381_v9  ;;  %v4383_v61 = vsel %vm104_vm10, 1.0, %v4129_v63  ;;  %vm145_vm10 = vcmp.eq.s32.totalorder %v120_v59, %v4375_v37 }
 0x26d   :  { %v481_v15 = vmul.f32 %v387_v7, %v4321_v0  ;;  %v483_v16 = vmul.f32 %v387_v7, %v4327_v4  ;;  %v485_v17 = vmul.f32 %v387_v7, %v4330_v5  ;;  %v487_v18 = vmul.f32 %v387_v7, %v4333_v6 }
 0x26e   :  { %390 = vxpose.xlu0.b32.start [1/2] (short) (narrow) %v294_v13, 32  ;;  %v480_v19 = vmul.f32 %v382_v14, %v4324_v3  ;;  %v482_v20 = vmul.f32 %v382_v14, %v4336_v10  ;;  %v484_v21 = vmul.f32 %v382_v14, %v4339_v11  ;;  %v486_v22 = vmul.f32 %v382_v14, %v4342_v12 }
 0x270   :  { %v4352_v24 = vpack.c.bf16 %v481_v15, %v480_v19  ;;  %v4354_v25 = vpack.c.bf16 %v483_v16, %v482_v20  ;;  %v4356_v26 = vpack.c.bf16 %v485_v17, %v484_v21  ;;  %v4358_v27 = vpack.c.bf16 %v487_v18, %v486_v22 }
 0x271   :  { %v99_v18 = vshra.s32 %v4277_v49, 3  ;;  %v100_v19 = vshra.s32 %v4268_v46, 3 }
 0x272   :  { %391 = vxpose.xlu0.b32.end [2/2] (short) (narrow) %v299_v23, 32 }
 0x273   :  { %vm106_vm13 = vcmp.eq.s32.totalorder %v99_v18, %v4375_v37  ;;  %vm107_vm14 = vcmp.eq.s32.totalorder %v100_v19, %v4375_v37  ;;  %v4500_v18 = vld [vmem:[#allocation4 + $0x8] sm:$0xff]  ;;  %v4502_v19 = vld [vmem:[#allocation4] sm:$0xff] }
 0x2ee   :  { %v406_v28 = vpop.trf.xlu0 }
 0x2ef   :  { %426 = vrot.lane.b32.xlu1 %v406_v28, %s4127_s2 }
 0x2f2   :  { %v407_v29 = vpop.trf.xlu0 }
 0x2f3   :  { %438 = vrot.lane.b32.xlu1 %v406_v28, %s4130_s4 }
 0x2f6   :  { %v408_v30 = vpop.trf.xlu0 }
 0x2f7   :  { %450 = vrot.lane.b32.xlu1 %v406_v28, %s4131_s28 }
 0x2fa   :  { %v409_v31 = vpop.trf.xlu0 }
 0x2fb   :  { %428 = vrot.lane.b32.xlu1 %v407_v29, %s4127_s2  ;;  %444 = vrot.lane.b32.xlu0 %v409_v31, %s4130_s4 }
 0x2ff   :  { %440 = vrot.lane.b32.xlu1 %v407_v29, %s4130_s4 }
 0x303   :  { %452 = vrot.lane.b32.xlu1 %v407_v29, %s4131_s28 }
 0x307   :  { %430 = vrot.lane.b32.xlu1 %v408_v30, %s4127_s2 }
 0x30b   :  { %442 = vrot.lane.b32.xlu1 %v408_v30, %s4130_s4 }
 0x30f   :  { %432 = vrot.lane.b32.xlu1 %v409_v31, %s4127_s2 }
 0x313   :  { %454 = vrot.lane.b32.xlu1 %v408_v30, %s4131_s28 }
 0x317   :  { %456 = vrot.lane.b32.xlu1 %v409_v31, %s4131_s28 }
 0x361   :  { %v427_v33 = vpop.permute.xlu1 %426 }
 0x362   :  { %v463_v41 = vsel %vm462_vm9, %v406_v28, %v427_v33  ;;  %v4406_v33 = vsel %vm107_vm14, 1.0, %v4129_v63  ;;  %vm148_vm14 = vcmp.eq.s32.totalorder %v123_v57, %v4375_v37  ;;  %v752_v57 = vld [vmem:[#allocation7 + $0x48] sm:$0xff] }
 0x363   :  { %v3724_v59 = vpack.c.bf16 %v752_v57, %v751_v56 }
 0x365   :  { %v439_v34 = vpop.permute.xlu1 %438 }
 0x366   :  { %v467_v42 = vsel %vm165_vm0, %v463_v41, %v439_v34  ;;  %v489_v41 = vld [vmem:[#allocation2 + $0x8] sm:$0xff] }
 0x369   :  { %v451_v35 = vpop.permute.xlu1 %450 }
 0x36a   :  { %v472_v44 = vsel %vm471_vm11, %v467_v42, %v451_v35  ;;  %v4132_v42 = vmov -1e+30  }
 0x36b   :  { %v476_v9 = vmul.f32 %v472_v44, %v4383_v61 }
 0x36d   :  { %v429_v38 = vpop.permute.xlu1 %428  ;;  %v445_v22 = vpop.permute.xlu0 %444 }
 0x36e   :  { %v464_v62 = vsel %vm462_vm9, %v407_v29, %v429_v38  ;;  %v4402_v29 = vsel %vm106_vm13, 1.0, %v4129_v63  ;;  %v157_v63 = vand.u32 1, %v4287_v53  ;;  %vm147_vm13 = vcmp.eq.s32.totalorder %v122_v60, %v4375_v37  ;;  %v754_v60 = vld [vmem:[#allocation7 + $0x58] sm:$0xff]  ;;  %v3140_v53 = vld [vmem:[#allocation9 + $0x15] ss:$0 sm:$0xff] }
 0x36f   :  { %v3728_v37 = vpack.c.bf16 %v754_v60, %v753_v58 }
 0x370   :  { %vm158_vm15 = vcmp.eq.s32.totalorder %v97_v36, %v157_v63  ;;  %vm159_vm1 = vcmp.eq.s32.totalorder %v98_v39, %v157_v63  ;;  %v4133_v36 = vmov 1.0|1.0  }
 0x371   :  { %v441_v40 = vpop.permute.xlu1 %440  ;;  %v4422_v44 = vsel %vm158_vm15, 0.0, %v4132_v42  ;;  %3693 = vmatprep.subr.msk.bf16.mxu1 %vm4436_vm5, %v4133_v36  ;;  %vm4474_vm15 = vmpackc.low %vm146_vm12, %vm145_vm10 }
 0x372   :  { %v468_v2 = vsel %vm165_vm0, %v464_v62, %v441_v40  ;;  %v4424_v62 = vsel %vm159_vm1, 0.0, %v4132_v42  ;;  %3695 = vmatpush3.bf16.msk.msra.mxu1 %vm4436_vm5, %v4133_v36  ;;  %vm4481_vm1 = vmpackc.low %vm148_vm14, %vm147_vm13 }
 0x373   :  { %3697 = vmatprep.subr.msk.bf16.mxu1 %vm4452_vm8, %v4133_v36 }
 0x375   :  { %v453_v7 = vpop.permute.xlu1 %452 }
 0x376   :  { %v473_v8 = vsel %vm471_vm11, %v468_v2, %v453_v7  ;;  %3699 = vmatpush3.bf16.msk.msra.mxu1 %vm4452_vm8, %v4133_v36 }
 0x377   :  { %v477_v13 = vmul.f32 %v473_v8, %v4388_v1  ;;  %3701 = vmatprep.subr.msk.bf16.mxu1 %vm4474_vm15, %v4133_v36 }
 0x379   :  { %v431_v14 = vpop.permute.xlu1 %430  ;;  %v3684_v15 = vpack.c.bf16 %v477_v13, %v476_v9 }
 0x37a   :  { %v465_v21 = vsel %vm462_vm9, %v408_v30, %v431_v14  ;;  %3703 = vmatpush3.bf16.msk.msra.mxu1 %vm4474_vm15, %v4133_v36 }
 0x37b   :  { %3685 = vmatprep.subr.bf16.mxu0 %v3684_v15  ;;  %3705 = vmatprep.subr.msk.bf16.mxu1 %vm4481_vm1, %v4133_v36 }
 0x37c   :  { %3687 = vmatpush3.bf16.msra.mxu0 %v3684_v15 }
 0x37d   :  { %v443_v16 = vpop.permute.xlu1 %442 }
 0x37e   :  { %v469_v28 = vsel %vm165_vm0, %v465_v21, %v443_v16  ;;  %3707 = vmatpush3.bf16.msk.msra.mxu1 %vm4481_vm1, %v4133_v36  ;;  %v3093_v21 = vld [vmem:[#allocation9 + $0x4] ss:$0 sm:$0xff] }
 0x37f   :  { %3725 = vmatprep.subr.bf16.mxu1 %v3724_v59 }
 0x381   :  { %v433_v17 = vpop.permute.xlu1 %432 }
 0x382   :  { %v466_v23 = vsel %vm462_vm9, %v409_v31, %v433_v17 }
 0x383   :  { %v470_v34 = vsel %vm165_vm0, %v466_v23, %v445_v22 }
 0x385   :  { %v455_v20 = vpop.permute.xlu1 %454 }
 0x386   :  { %v474_v32 = vsel %vm471_vm11, %v469_v28, %v455_v20 }
 0x387   :  { %v478_v30 = vmul.f32 %v474_v32, %v4402_v29 }
 0x389   :  { %v457_v35 = vpop.permute.xlu1 %456 }
 0x38a   :  { %v475_v38 = vsel %vm471_vm11, %v470_v34, %v457_v35 }
 0x38b   :  { %v479_v40 = vmul.f32 %v475_v38, %v4406_v33 }
 0x38d   :  { %v3688_v31 = vpack.c.bf16 %v479_v40, %v478_v30 }
 0x38f   :  { %3689 = vmatprep.subr.bf16.mxu0 %v3688_v31 }
 0x390   :  { %3691 = vmatpush3.bf16.msra.mxu0 %v3688_v31 }
 0x391   :  { %3709 = vmatprep.subr.bf16.mxu0 %v4352_v24 }
 0x393   :  { %3376 = vmatmul.mubr.msk.f32.vlgmr.msra.gmra.mrb[2].mxu0 %vm165_vm0, %v489_v41 }
 0x394   :  { %3711 = vmatpush3.bf16.msra.mxu0 %v4352_v24 }
 0x395   :  { %3713 = vmatprep.subr.bf16.mxu0 %v4354_v25 }
 0x398   :  { %3715 = vmatpush3.bf16.msra.mxu0 %v4354_v25 }
 0x399   :  { %3717 = vmatprep.subr.bf16.mxu0 %v4356_v26 }
 0x39c   :  { %3719 = vmatpush3.bf16.msra.mxu0 %v4356_v26 }
 0x39d   :  { %3721 = vmatprep.subr.bf16.mxu0 %v4358_v27 }
 0x3a0   :  { %3723 = vmatpush3.bf16.msra.mxu0 %v4358_v27 }
 0x466   :  { %v3377_v24 = vpop.f32.mrb[2].mxu0 }
 0x467   :  { %v562_v2 = vpop.f32.mrb[3].mxu0  ;;  %v568_v26 = vadd.f32 %v3377_v24, %v4424_v62 }
 0x468   :  { %v563_v25 = vadd.f32 %v562_v2, %v4422_v44 }
 0x469   :  { %v575_v27 = vsel %vm571_vm2, %v568_v26, -inf }
 0x46a   :  { %v572_v7 = vsel %vm571_vm2, %v563_v25, -inf }
 0x46b   :  { %573 = vmax.xlane.f32.xlu1 %v572_v7  ;;  %v895_v7 = vld [vmem:[#allocation7 + $0x60] sm:$0xff] }
 0x46f   :  { %576 = vmax.xlane.f32.xlu1 %v575_v27  ;;  %v896_v27 = vld [vmem:[#allocation7 + $0x68] sm:$0xff] }
 0x4f8   :  { %v574_v47 = vpop.xlane.xlu1 %573 }
 0x4f9   :  { %v578_v48 = vsub.f32 %v563_v25, %v574_v47  ;;  %v3732_v47 = vpack.c.bf16 %v896_v27, %v895_v7 }
 0x4fb   :  { %v580_v49 = vmul.f32 1.442695, %v578_v48  ;;  %3733 = vmatprep.subr.bf16.mxu0 %v3732_v47  ;;  %v897_v48 = vld [vmem:[#allocation7 + $0x70] sm:$0xff] }
 0x4fc   :  { %v577_v50 = vpop.xlane.xlu1 %576 }
 0x4fd   :  { %3934 = vpow2.f32 %v580_v49  ;;  %v579_v51 = vsub.f32 %v568_v26, %v577_v50  ;;  %v898_v49 = vld [vmem:[#allocation7 + $0x78] sm:$0xff] }
 0x4fe   :  { %v3736_v50 = vpack.c.bf16 %v898_v49, %v897_v48 }
 0x4ff   :  { %v582_v52 = vmul.f32 1.442695, %v579_v51 }
 0x501   :  { %3936 = vpow2.f32 %v582_v52 }
 0x507   :  { %v3935_v54 = vpop.eup %3934 }
 0x508   :  { %3394 = vmatprep.mubr.msk.f32.mxu1 %vm571_vm2, %v3935_v54 }
 0x50b   :  { %v3937_v55 = vpop.eup %3936 }
 0x50c   :  { %3395 = vmatmul.mubr.msk.f32.vlgmr.msra.gmra.mrb[2].mxu1 %vm571_vm2, %v3937_v55 }
 0x50d   :  { %3727 = vmatpush3.bf16.msra.mxu1 %v3724_v59  ;;  %v3094_v59 = vld [vmem:[#allocation9 + $0x5] ss:$0 sm:$0xff] }
 0x50e   :  { %3729 = vmatprep.subr.bf16.mxu1 %v3728_v37 }
 0x511   :  { %3731 = vmatpush3.bf16.msra.mxu1 %v3728_v37  ;;  %v3095_v37 = vld [vmem:[#allocation9 + $0x6] ss:$0 sm:$0xff] }
 0x5df   :  { %v3396_v39 = vpop.f32.mrb[2].mxu1 }
 0x5e0   :  { %3938 = vrcp.f32 %v3396_v39  ;;  %v656_v8 = vpop.f32.mrb[3].mxu1 }
 0x5e1   :  { %3940 = vrcp.f32 %v656_v8 }
 0x5ea   :  { %v3939_v9 = vpop.eup %3938 }
 0x5eb   :  { %v3941_v13 = vpop.eup %3940  ;;  %v668_v15 = vmul.f32 %v3939_v9, %v3937_v55 }
 0x5ec   :  { %v666_v14 = vmul.f32 %v3941_v13, %v3935_v54 }
 0x5ee   :  { %3413 = vmatprep.mubr.msk.f32.mxu0 %vm571_vm2, %v666_v14 }
 0x5ef   :  { %3414 = vmatmul.mubr.msk.f32.vlgmr.msra.gmra.mrb[4].mxu0 %vm571_vm2, %v668_v15 }
 0x5f0   :  { %3735 = vmatpush3.bf16.msra.mxu0 %v3732_v47 }
 0x5f1   :  { %3737 = vmatprep.subr.bf16.mxu0 %v3736_v50 }
 0x5f4   :  { %3739 = vmatpush3.bf16.msra.mxu0 %v3736_v50 }
 0x6c2   :  { %v3415_v16 = vpop.f32.mrb[4].mxu0 }
 0x6c3   :  { %v741_v17 = vpop.f32.mrb[5].mxu0 }
 0x6c4   :  { %3424 = vmatprep.mubr.msk.f32.mxu1 %vm165_vm0, %v741_v17  ;;  %v1002_v17 = vld [vmem:[#allocation7 + $0x88] sm:$0xff] }
 0x6c5   :  { %3425 = vmatmul.mubr.msk.f32.vlgmr.msra.gmra.mrb[4].mxu1 %vm165_vm0, %v3415_v16  ;;  %v1001_v16 = vld [vmem:[#allocation7 + $0x80] sm:$0xff] }
 0x798   :  { %v3426_v20 = vpop.f32.mrb[4].mxu1 }
 0x799   :  { %v837_v22 = vadd.f32 %v3426_v20, %v4500_v18  ;;  %v827_v23 = vpop.f32.mrb[5].mxu1  ;;  %v3740_v20 = vpack.c.bf16 %v1002_v17, %v1001_v16  ;;  %v1146_v16 = vld [vmem:[#allocation7 + $0xa8] sm:$0xff]  ;;  %v1239_v17 = vld [vmem:[#allocation7 + $0xc0] sm:$0xff] }
 0x79a   :  { %v836_v28 = vadd.f32 %v827_v23, %v4502_v19 }
 0x79b   :  { %v4506_v32 = vadd.f32 %v3093_v21, %v837_v22  ;;  %3741 = vmatprep.subr.bf16.mxu1 %v3740_v20  ;;  %v1004_v22 = vld [vmem:[#allocation7 + $0x98] sm:$0xff] }
 0x79c   :  { %v4508_v34 = vadd.f32 %v3093_v21, %v836_v28  ;;  %3743 = vmatpush3.bf16.msra.mxu1 %v3740_v20  ;;  %v1003_v21 = vld [vmem:[#allocation7 + $0x90] sm:$0xff]  ;;  %v3096_v28 = vld [vmem:[#allocation9 + $0x7] ss:$0 sm:$0xff] }
 0x79d   :  { %v855_v35 = vsel %vm165_vm0, %v4506_v32, 0.0  ;;  %v3744_v23 = vpack.c.bf16 %v1004_v22, %v1003_v21  ;;  %v1240_v21 = vld [vmem:[#allocation7 + $0xc8] sm:$0xff] }
 0x79e   :  { %856 = vadd.xlane.f32.xlu0 %v855_v35  ;;  %v852_v38 = vsel %vm165_vm0, %v4508_v34, 0.0  ;;  %v3756_v22 = vpack.c.bf16 %v1240_v21, %v1239_v17 }
 0x79f   :  { %853 = vadd.xlane.f32.xlu1 %v852_v38  ;;  %3745 = vmatprep.subr.bf16.mxu1 %v3744_v23 }
 0x7a0   :  { %3747 = vmatpush3.bf16.msra.mxu1 %v3744_v23  ;;  %v1147_v23 = vld [vmem:[#allocation7 + $0xb0] sm:$0xff] }
 0x7a1   :  { %3757 = vmatprep.subr.bf16.mxu1 %v3756_v22 }
 0x82b   :  { %v857_v30 = vpop.xlane.xlu0 %856 }
 0x82c   :  { %v859_v40 = vmul.f32 0.03125, %v857_v30  ;;  %v854_v31 = vpop.xlane.xlu1 %853 }
 0x82d   :  { %v858_v41 = vmul.f32 0.03125, %v854_v31 }
 0x82e   :  { %v861_v63 = vsub.f32 %v4506_v32, %v859_v40 }
 0x82f   :  { %v860_v42 = vsub.f32 %v4508_v34, %v858_v41 }
 0x830   :  { %v863_v25 = vmul.f32 %v861_v63, %v861_v63 }
 0x831   :  { %v862_v24 = vmul.f32 %v860_v42, %v860_v42 }
 0x832   :  { %v867_v26 = vsel %vm165_vm0, %v863_v25, 0.0 }
 0x833   :  { %v864_v2 = vsel %vm165_vm0, %v862_v24, 0.0 }
 0x834   :  { %865 = vadd.xlane.f32.xlu1 %v864_v2 }
 0x838   :  { %868 = vadd.xlane.f32.xlu1 %v867_v26 }
 0x8c1   :  { %v866_v51 = vpop.xlane.xlu1 %865 }
 0x8c2   :  { %v870_v52 = vmul.f32 0.03125, %v866_v51  ;;  %v3101_v51 = vld [vmem:[#allocation9 + $0x8] ss:$0 sm:$0xff] }
 0x8c4   :  { %v872_v54 = vadd.f32 1e-05, %v870_v52 }
 0x8c5   :  { %v869_v55 = vpop.xlane.xlu1 %868 }
 0x8c6   :  { %3942 = vrsqrt.f32 %v872_v54  ;;  %v871_v56 = vmul.f32 0.03125, %v869_v55 }
 0x8c8   :  { %v873_v57 = vadd.f32 1e-05, %v871_v56 }
 0x8ca   :  { %3944 = vrsqrt.f32 %v873_v57 }
 0x8d0   :  { %v3943_v58 = vpop.eup %3942 }
 0x8d1   :  { %v876_v60 = vmul.f32 %v3943_v58, %v860_v42 }
 0x8d3   :  { %v884_v39 = vmul.f32 %v3094_v59, %v876_v60 }
 0x8d4   :  { %v3945_v8 = vpop.eup %3944 }
 0x8d5   :  { %v877_v9 = vmul.f32 %v3945_v8, %v861_v63  ;;  %v892_v13 = vadd.f32 %v3095_v37, %v884_v39 }
 0x8d7   :  { %v885_v14 = vmul.f32 %v3094_v59, %v877_v9  ;;  %3435 = vmatprep.mubr.msk.f32.mxu0 %vm165_vm0, %v892_v13 }
 0x8d9   :  { %v893_v15 = vadd.f32 %v3095_v37, %v885_v14 }
 0x8db   :  { %3436 = vmatmul.mubr.msk.f32.vlgmr.msra.gmra.mrb[6].mxu0 %vm165_vm0, %v893_v15  ;;  %v1145_v15 = vld [vmem:[#allocation7 + $0xa0] sm:$0xff] }
 0x8dc   :  { %v3748_v20 = vpack.c.bf16 %v1146_v16, %v1145_v15 }
 0x8de   :  { %3749 = vmatprep.subr.bf16.mxu0 %v3748_v20 }
 0x8df   :  { %3751 = vmatpush3.bf16.msra.mxu0 %v3748_v20 }
 0x9ae   :  { %v3437_v35 = vpop.f32.mrb[6].mxu0 }
 0x9af   :  { %v985_v38 = vadd.f32 %v3437_v35, %v3096_v28  ;;  %v979_v30 = vpop.f32.mrb[7].mxu0 }
 0x9b0   :  { %v980_v40 = vadd.f32 %v3096_v28, %v979_v30  ;;  %v1148_v28 = vld [vmem:[#allocation7 + $0xb8] sm:$0xff] }
 0x9b1   :  { %v989_v31 = vmul.f32 -1.702, %v985_v38  ;;  %v3752_v35 = vpack.c.bf16 %v1148_v28, %v1147_v23  ;;  %v1242_v30 = vld [vmem:[#allocation7 + $0xd8] sm:$0xff] }
 0x9b2   :  { %v988_v41 = vmul.f32 -1.702, %v980_v40 }
 0x9b3   :  { %v992_v63 = vmul.f32 1.442695, %v989_v31  ;;  %3753 = vmatprep.subr.bf16.mxu0 %v3752_v35 }
 0x9b4   :  { %v990_v42 = vmul.f32 1.442695, %v988_v41  ;;  %3755 = vmatpush3.bf16.msra.mxu0 %v3752_v35 }
 0x9b5   :  { %3946 = vpow2.f32 %v992_v63 }
 0x9b6   :  { %3948 = vpow2.f32 %v990_v42 }
 0x9bf   :  { %v3947_v24 = vpop.eup %3946 }
 0x9c0   :  { %v3949_v2 = vpop.eup %3948  ;;  %v995_v25 = vadd.f32 1.0, %v3947_v24 }
 0x9c1   :  { %v994_v26 = vadd.f32 1.0, %v3949_v2 }
 0x9c2   :  { %3950 = vrcp.f32 %v995_v25 }
 0x9c3   :  { %3952 = vrcp.f32 %v994_v26  ;;  %v3102_v26 = vld [vmem:[#allocation9 + $0x9] ss:$0 sm:$0xff] }
 0x9cc   :  { %v3951_v7 = vpop.eup %3950 }
 0x9cd   :  { %v3953_v27 = vpop.eup %3952  ;;  %v999_v48 = vmul.f32 %v3951_v7, %v985_v38  ;;  %v1241_v38 = vld [vmem:[#allocation7 + $0xd0] sm:$0xff] }
 0x9ce   :  { %v997_v47 = vmul.f32 %v3953_v27, %v980_v40  ;;  %v3760_v40 = vpack.c.bf16 %v1242_v30, %v1241_v38  ;;  %v3103_v27 = vld [vmem:[#allocation9 + $0xa] ss:$0 sm:$0xff] }
 0x9d0   :  { %3446 = vmatprep.mubr.msk.f32.mxu1 %vm165_vm0, %v997_v47 }
 0x9d1   :  { %3447 = vmatmul.mubr.msk.f32.vlgmr.msra.gmra.mrb[6].mxu1 %vm165_vm0, %v999_v48 }
 0x9d2   :  { %3759 = vmatpush3.bf16.msra.mxu1 %v3756_v22 }
 0x9d3   :  { %3761 = vmatprep.subr.bf16.mxu1 %v3760_v40 }
 0x9d6   :  { %3763 = vmatpush3.bf16.msra.mxu1 %v3760_v40  ;;  %v1423_v40 = vld [vmem:[#allocation2 + $0x10] sm:$0xff] }
 0x9d7   :  { %3773 = vmatprep.subr.msk.bf16.mxu1 %vm4436_vm5, %v4133_v36 }
 0xaa4   :  { %v3448_v49 = vpop.f32.mrb[6].mxu1 }
 0xaa5   :  { %v1077_v50 = vpop.f32.mrb[7].mxu1  ;;  %v1087_v52 = vadd.f32 %v3448_v49, %v4506_v32 }
 0xaa6   :  { %v1086_v54 = vadd.f32 %v1077_v50, %v4508_v34 }
 0xaa7   :  { %v1097_v57 = vadd.f32 %v3101_v51, %v1087_v52 }
 0xaa8   :  { %v1096_v55 = vadd.f32 %v3101_v51, %v1086_v54  ;;  %v3107_v54 = vld [vmem:[#allocation9 + $0xc] ss:$0 sm:$0xff] }
 0xaa9   :  { %v1105_v58 = vsel %vm165_vm0, %v1097_v57, 0.0 }
 0xaaa   :  { %v1102_v56 = vsel %vm165_vm0, %v1096_v55, 0.0 }
 0xaab   :  { %1103 = vadd.xlane.f32.xlu1 %v1102_v56 }
 0xaaf   :  { %1106 = vadd.xlane.f32.xlu1 %v1105_v58 }
 0xb38   :  { %v1104_v59 = vpop.xlane.xlu1 %1103 }
 0xb39   :  { %v1108_v60 = vmul.f32 0.03125, %v1104_v59 }
 0xb3b   :  { %v1110_v37 = vsub.f32 %v1096_v55, %v1108_v60  ;;  %v3104_v55 = vld [vmem:[#allocation9 + $0xb] ss:$0 sm:$0xff] }
 0xb3c   :  { %v1107_v39 = vpop.xlane.xlu1 %1106 }
 0xb3d   :  { %v1109_v8 = vmul.f32 0.03125, %v1107_v39  ;;  %v1112_v9 = vmul.f32 %v1110_v37, %v1110_v37 }
 0xb3f   :  { %v1111_v13 = vsub.f32 %v1097_v57, %v1109_v8  ;;  %v1114_v14 = vsel %vm165_vm0, %v1112_v9, 0.0 }
 0xb40   :  { %1115 = vadd.xlane.f32.xlu1 %v1114_v14 }
 0xb41   :  { %v1113_v32 = vmul.f32 %v1111_v13, %v1111_v13 }
 0xb43   :  { %v1117_v34 = vsel %vm165_vm0, %v1113_v32, 0.0 }
 0xb44   :  { %1118 = vadd.xlane.f32.xlu1 %v1117_v34 }
 0xbcd   :  { %v1116_v31 = vpop.xlane.xlu1 %1115 }
 0xbce   :  { %v1120_v41 = vmul.f32 0.03125, %v1116_v31 }
 0xbd0   :  { %v1122_v63 = vadd.f32 1e-05, %v1120_v41 }
 0xbd1   :  { %v1119_v42 = vpop.xlane.xlu1 %1118 }
 0xbd2   :  { %3954 = vrsqrt.f32 %v1122_v63  ;;  %v1121_v24 = vmul.f32 0.03125, %v1119_v42 }
 0xbd4   :  { %v1123_v2 = vadd.f32 1e-05, %v1121_v24 }
 0xbd6   :  { %3956 = vrsqrt.f32 %v1123_v2 }
 0xbdc   :  { %v3955_v25 = vpop.eup %3954 }
 0xbdd   :  { %v1126_v7 = vmul.f32 %v3955_v25, %v1110_v37 }
 0xbdf   :  { %v1134_v47 = vmul.f32 %v3102_v26, %v1126_v7 }
 0xbe0   :  { %v3957_v48 = vpop.eup %3956 }
 0xbe1   :  { %v1127_v49 = vmul.f32 %v3957_v48, %v1111_v13  ;;  %v1142_v50 = vadd.f32 %v3103_v27, %v1134_v47 }
 0xbe3   :  { %v1135_v51 = vmul.f32 %v3102_v26, %v1127_v49  ;;  %3457 = vmatprep.mubr.msk.f32.mxu0 %vm165_vm0, %v1142_v50  ;;  %3468 = vmatprep.mubr.msk.f32.mxu1 %vm165_vm0, %v1142_v50 }
 0xbe5   :  { %v1143_v52 = vadd.f32 %v3103_v27, %v1135_v51 }
 0xbe7   :  { %3458 = vmatmul.mubr.msk.f32.vlgmr.msra.gmra.mrb[8].mxu0 %vm165_vm0, %v1143_v52  ;;  %3469 = vmatmul.mubr.msk.f32.vlgmr.msra.gmra.mrb[8].mxu1 %vm165_vm0, %v1143_v52 }
 0xbe8   :  { %3775 = vmatpush3.bf16.msk.msra.mxu1 %vm4436_vm5, %v4133_v36  ;;  %3479 = vmatprep.mubr.msk.f32.mxu0 %vm165_vm0, %v1423_v40 }
 0xbe9   :  { %3777 = vmatprep.subr.msk.bf16.mxu1 %vm4452_vm8, %v4133_v36 }
 0xbec   :  { %3779 = vmatpush3.bf16.msk.msra.mxu1 %vm4452_vm8, %v4133_v36 }
 0xbed   :  { %3781 = vmatprep.subr.msk.bf16.mxu1 %vm4474_vm15, %v4133_v36 }
 0xbf0   :  { %3783 = vmatpush3.bf16.msk.msra.mxu1 %vm4474_vm15, %v4133_v36 }
 0xbf1   :  { %3785 = vmatprep.subr.msk.bf16.mxu1 %vm4481_vm1, %v4133_v36 }
 0xbf4   :  { %3787 = vmatpush3.bf16.msk.msra.mxu1 %vm4481_vm1, %v4133_v36 }
 0xcba   :  { %v3459_v56 = vpop.f32.mrb[8].mxu0  ;;  %v3470_v57 = vpop.f32.mrb[8].mxu1 }
 0xcbb   :  { %v1323_v58 = vadd.f32 %v3470_v57, %v3107_v54  ;;  %v1229_v59 = vpop.f32.mrb[9].mxu0  ;;  %v1317_v60 = vpop.f32.mrb[9].mxu1  ;;  %v1235_v17 = vadd.f32 %v3459_v56, %v3104_v55 }
 0xcbc   :  { %v1230_v37 = vadd.f32 %v3104_v55, %v1229_v59  ;;  %v1318_v39 = vadd.f32 %v3107_v54, %v1317_v60 }
 0xcbd   :  { %v1415_v8 = vmul.f32 %v1323_v58, %v4321_v0  ;;  %v1417_v9 = vmul.f32 %v1323_v58, %v4327_v4  ;;  %v1419_v13 = vmul.f32 %v1323_v58, %v4330_v5  ;;  %v1421_v14 = vmul.f32 %v1323_v58, %v4333_v6 }
 0xcbe   :  { %1326 = vxpose.xlu1.b32.start [1/2] (short) (narrow) %v1230_v37, 32  ;;  %v1414_v32 = vmul.f32 %v1318_v39, %v4324_v3  ;;  %v1416_v34 = vmul.f32 %v1318_v39, %v4336_v10  ;;  %v1418_v15 = vmul.f32 %v1318_v39, %v4339_v11  ;;  %v1420_v16 = vmul.f32 %v1318_v39, %v4342_v12 }
 0xcc0   :  { %v3788_v20 = vpack.c.bf16 %v1415_v8, %v1414_v32  ;;  %v3792_v21 = vpack.c.bf16 %v1417_v9, %v1416_v34  ;;  %v3796_v22 = vpack.c.bf16 %v1419_v13, %v1418_v15  ;;  %v3800_v23 = vpack.c.bf16 %v1421_v14, %v1420_v16  ;;  %v1424_v34 = vld [vmem:[#allocation2 + $0x18] sm:$0xff] }
 0xcc2   :  { %1327 = vxpose.xlu1.b32.end [2/2] (short) (narrow) %v1235_v17, 32 }
 0xd3e   :  { %v1342_v28 = vpop.trf.xlu1 }
 0xd3f   :  { %1362 = vrot.lane.b32.xlu0 %v1342_v28, %s4127_s2 }
 0xd42   :  { %v1343_v35 = vpop.trf.xlu1 }
 0xd43   :  { %1374 = vrot.lane.b32.xlu0 %v1342_v28, %s4130_s4 }
 0xd46   :  { %v1344_v38 = vpop.trf.xlu1 }
 0xd47   :  { %1386 = vrot.lane.b32.xlu0 %v1342_v28, %s4131_s28 }
 0xd4a   :  { %v1345_v30 = vpop.trf.xlu1 }
 0xd4b   :  { %1364 = vrot.lane.b32.xlu0 %v1343_v35, %s4127_s2  ;;  %1380 = vrot.lane.b32.xlu1 %v1345_v30, %s4130_s4 }
 0xd4f   :  { %1376 = vrot.lane.b32.xlu0 %v1343_v35, %s4130_s4 }
 0xd53   :  { %1388 = vrot.lane.b32.xlu0 %v1343_v35, %s4131_s28 }
 0xd57   :  { %1366 = vrot.lane.b32.xlu0 %v1344_v38, %s4127_s2 }
 0xd5b   :  { %1378 = vrot.lane.b32.xlu0 %v1344_v38, %s4130_s4 }
 0xd5f   :  { %1368 = vrot.lane.b32.xlu0 %v1345_v30, %s4127_s2 }
 0xd63   :  { %1390 = vrot.lane.b32.xlu0 %v1344_v38, %s4131_s28 }
 0xd67   :  { %1392 = vrot.lane.b32.xlu0 %v1345_v30, %s4131_s28 }
 0xdb1   :  { %v1363_v31 = vpop.permute.xlu0 %1362 }
 0xdb2   :  { %v1398_v2 = vsel %vm462_vm9, %v1342_v28, %v1363_v31 }
 0xdb5   :  { %v1375_v41 = vpop.permute.xlu0 %1374 }
 0xdb6   :  { %v1402_v25 = vsel %vm165_vm0, %v1398_v2, %v1375_v41 }
 0xdb9   :  { %v1387_v63 = vpop.permute.xlu0 %1386 }
 0xdba   :  { %v1406_v26 = vsel %vm471_vm11, %v1402_v25, %v1387_v63  ;;  %v1685_v63 = vld [vmem:[#allocation7 + $0xe0] sm:$0xff]  ;;  %v1688_v25 = vld [vmem:[#allocation7 + $0xf8] sm:$0xff] }
 0xdbb   :  { %v1410_v49 = vmul.f32 %v1406_v26, %v4383_v61 }
 0xdbd   :  { %v1365_v42 = vpop.permute.xlu0 %1364  ;;  %v1381_v58 = vpop.permute.xlu1 %1380 }
 0xdbe   :  { %v1399_v7 = vsel %vm462_vm9, %v1343_v35, %v1365_v42  ;;  %v1686_v42 = vld [vmem:[#allocation7 + $0xe8] sm:$0xff] }
 0xdbf   :  { %v3804_v2 = vpack.c.bf16 %v1686_v42, %v1685_v63  ;;  %v3127_v42 = vld [vmem:[#allocation9 + $0xe] ss:$0 sm:$0xff] }
 0xdc1   :  { %v1377_v24 = vpop.permute.xlu0 %1376  ;;  %3805 = vmatprep.subr.bf16.mxu1 %v3804_v2 }
 0xdc2   :  { %v1403_v27 = vsel %vm165_vm0, %v1399_v7, %v1377_v24  ;;  %v1687_v24 = vld [vmem:[#allocation7 + $0xf0] sm:$0xff] }
 0xdc3   :  { %v3808_v26 = vpack.c.bf16 %v1688_v25, %v1687_v24 }
 0xdc5   :  { %v1389_v47 = vpop.permute.xlu0 %1388 }
 0xdc6   :  { %v1407_v48 = vsel %vm471_vm11, %v1403_v27, %v1389_v47 }
 0xdc7   :  { %v1411_v50 = vmul.f32 %v1407_v48, %v4388_v1 }
 0xdc9   :  { %v1367_v51 = vpop.permute.xlu0 %1366  ;;  %v3764_v52 = vpack.c.bf16 %v1411_v50, %v1410_v49 }
 0xdca   :  { %v1400_v57 = vsel %vm462_vm9, %v1344_v38, %v1367_v51 }
 0xdcb   :  { %3765 = vmatprep.subr.bf16.mxu0 %v3764_v52 }
 0xdcc   :  { %3767 = vmatpush3.bf16.msra.mxu0 %v3764_v52 }
 0xdcd   :  { %v1379_v54 = vpop.permute.xlu0 %1378 }
 0xdce   :  { %v1404_v60 = vsel %vm165_vm0, %v1400_v57, %v1379_v54 }
 0xdd1   :  { %v1369_v55 = vpop.permute.xlu0 %1368 }
 0xdd2   :  { %v1401_v59 = vsel %vm462_vm9, %v1345_v30, %v1369_v55  ;;  %v3126_v55 = vld [vmem:[#allocation9 + $0xd] ss:$0 sm:$0xff] }
 0xdd3   :  { %v1405_v39 = vsel %vm165_vm0, %v1401_v59, %v1381_v58 }
 0xdd5   :  { %v1391_v56 = vpop.permute.xlu0 %1390 }
 0xdd6   :  { %v1408_v37 = vsel %vm471_vm11, %v1404_v60, %v1391_v56 }
 0xdd7   :  { %v1412_v13 = vmul.f32 %v1408_v37, %v4402_v29 }
 0xdd9   :  { %v1393_v8 = vpop.permute.xlu0 %1392 }
 0xdda   :  { %v1409_v9 = vsel %vm471_vm11, %v1405_v39, %v1393_v8 }
 0xddb   :  { %v1413_v14 = vmul.f32 %v1409_v9, %v4406_v33 }
 0xddd   :  { %v3768_v32 = vpack.c.bf16 %v1413_v14, %v1412_v13 }
 0xddf   :  { %3769 = vmatprep.subr.bf16.mxu0 %v3768_v32 }
 0xde0   :  { %3771 = vmatpush3.bf16.msra.mxu0 %v3768_v32 }
 0xde1   :  { %3789 = vmatprep.subr.bf16.mxu0 %v3788_v20 }
 0xde3   :  { %3480 = vmatmul.mubr.msk.f32.vlgmr.msra.gmra.mrb[10].mxu0 %vm165_vm0, %v1424_v34 }
 0xde4   :  { %3791 = vmatpush3.bf16.msra.mxu0 %v3788_v20 }
 0xde5   :  { %3793 = vmatprep.subr.bf16.mxu0 %v3792_v21 }
 0xde8   :  { %3795 = vmatpush3.bf16.msra.mxu0 %v3792_v21 }
 0xde9   :  { %3797 = vmatprep.subr.bf16.mxu0 %v3796_v22 }
 0xdec   :  { %3799 = vmatpush3.bf16.msra.mxu0 %v3796_v22 }
 0xded   :  { %3801 = vmatprep.subr.bf16.mxu0 %v3800_v23 }
 0xdf0   :  { %3803 = vmatpush3.bf16.msra.mxu0 %v3800_v23 }
 0xeb6   :  { %v3481_v15 = vpop.f32.mrb[10].mxu0 }
 0xeb7   :  { %v1503_v16 = vadd.f32 %v3481_v15, %v4424_v62  ;;  %v1497_v17 = vpop.f32.mrb[11].mxu0 }
 0xeb8   :  { %v1498_v28 = vadd.f32 %v1497_v17, %v4422_v44  ;;  %v1829_v17 = vld [vmem:[#allocation7 + $0x100] sm:$0xff] }
 0xeb9   :  { %v1509_v35 = vsel %vm571_vm2, %v1503_v16, -inf }
 0xeba   :  { %1510 = vmax.xlane.f32.xlu1 %v1509_v35  ;;  %v1506_v38 = vsel %vm571_vm2, %v1498_v28, -inf }
 0xebb   :  { %1507 = vmax.xlane.f32.xlu0 %v1506_v38  ;;  %v1831_v38 = vld [vmem:[#allocation7 + $0x110] sm:$0xff] }
 0xf47   :  { %v1511_v30 = vpop.xlane.xlu1 %1510 }
 0xf48   :  { %v1513_v20 = vsub.f32 %v1503_v16, %v1511_v30  ;;  %v1508_v40 = vpop.xlane.xlu0 %1507  ;;  %v1832_v30 = vld [vmem:[#allocation7 + $0x118] sm:$0xff] }
 0xf49   :  { %v1512_v21 = vsub.f32 %v1498_v28, %v1508_v40  ;;  %v1830_v28 = vld [vmem:[#allocation7 + $0x108] sm:$0xff] }
 0xf4a   :  { %v1516_v31 = vmul.f32 1.442695, %v1513_v20  ;;  %v3812_v35 = vpack.c.bf16 %v1830_v28, %v1829_v17  ;;  %v3816_v20 = vpack.c.bf16 %v1832_v30, %v1831_v38  ;;  %v3134_v30 = vld [vmem:[#allocation9 + $0x11] ss:$0 sm:$0xff] }
 0xf4b   :  { %v1514_v22 = vmul.f32 1.442695, %v1512_v21 }
 0xf4c   :  { %3813 = vmatprep.subr.bf16.mxu0 %v3812_v35 }
 0xf4d   :  { %3958 = vpow2.f32 %v1514_v22 }
 0xf4e   :  { %3960 = vpow2.f32 %v1516_v31 }
 0xf57   :  { %v3959_v23 = vpop.eup %3958 }
 0xf58   :  { %v3961_v41 = vpop.eup %3960  ;;  %3498 = vmatprep.mubr.msk.f32.mxu1 %vm571_vm2, %v3959_v23 }
 0xf59   :  { %3499 = vmatmul.mubr.msk.f32.vlgmr.msra.gmra.mrb[10].mxu1 %vm571_vm2, %v3961_v41 }
 0xf5a   :  { %3807 = vmatpush3.bf16.msra.mxu1 %v3804_v2  ;;  %v3128_v2 = vld [vmem:[#allocation9 + $0xf] ss:$0 sm:$0xff] }
 0xf5b   :  { %3809 = vmatprep.subr.bf16.mxu1 %v3808_v26 }
 0xf5e   :  { %3811 = vmatpush3.bf16.msra.mxu1 %v3808_v26 }
0x102c   :  { %v3500_v7 = vpop.f32.mrb[10].mxu1 }
0x102d   :  { %3962 = vrcp.f32 %v3500_v7  ;;  %v1590_v27 = vpop.f32.mrb[11].mxu1 }
0x102e   :  { %3964 = vrcp.f32 %v1590_v27 }
0x1037   :  { %v3963_v47 = vpop.eup %3962 }
0x1038   :  { %v3965_v48 = vpop.eup %3964  ;;  %v1602_v50 = vmul.f32 %v3963_v47, %v3961_v41 }
0x1039   :  { %v1600_v49 = vmul.f32 %v3965_v48, %v3959_v23 }
0x103b   :  { %3517 = vmatprep.mubr.msk.f32.mxu0 %vm571_vm2, %v1600_v49  ;;  %v1935_v49 = vld [vmem:[#allocation7 + $0x120] sm:$0xff] }
0x103c   :  { %3518 = vmatmul.mubr.msk.f32.vlgmr.msra.gmra.mrb[12].mxu0 %vm571_vm2, %v1602_v50  ;;  %v1936_v50 = vld [vmem:[#allocation7 + $0x128] sm:$0xff] }
0x103d   :  { %3815 = vmatpush3.bf16.msra.mxu0 %v3812_v35 }
0x103e   :  { %3817 = vmatprep.subr.bf16.mxu0 %v3816_v20 }
0x1041   :  { %3819 = vmatpush3.bf16.msra.mxu0 %v3816_v20 }
0x110f   :  { %v3519_v51 = vpop.f32.mrb[12].mxu0 }
0x1110   :  { %v1675_v52 = vpop.f32.mrb[13].mxu0 }
0x1111   :  { %3528 = vmatprep.mubr.msk.f32.mxu1 %vm165_vm0, %v1675_v52  ;;  %v1937_v52 = vld [vmem:[#allocation7 + $0x130] sm:$0xff] }
0x1112   :  { %3529 = vmatmul.mubr.msk.f32.vlgmr.msra.gmra.mrb[12].mxu1 %vm165_vm0, %v3519_v51  ;;  %v3820_v51 = vpack.c.bf16 %v1936_v50, %v1935_v49  ;;  %v2174_v50 = vld [vmem:[#allocation7 + $0x168] sm:$0xff] }
0x1114   :  { %3821 = vmatprep.subr.bf16.mxu1 %v3820_v51 }
0x1115   :  { %3823 = vmatpush3.bf16.msra.mxu1 %v3820_v51 }
0x11e5   :  { %v3530_v54 = vpop.f32.mrb[12].mxu1 }
0x11e6   :  { %v1761_v56 = vpop.f32.mrb[13].mxu1  ;;  %v1771_v57 = vadd.f32 %v3530_v54, %v4500_v18  ;;  %v1938_v54 = vld [vmem:[#allocation7 + $0x138] sm:$0xff] }
0x11e7   :  { %v1770_v58 = vadd.f32 %v1761_v56, %v4502_v19  ;;  %v3129_v56 = vld [vmem:[#allocation9 + $0x10] ss:$0 sm:$0xff] }
0x11e8   :  { %v4608_v60 = vadd.f32 %v3126_v55, %v1771_v57 }
0x11e9   :  { %v4606_v59 = vadd.f32 %v3126_v55, %v1770_v58  ;;  %v3824_v55 = vpack.c.bf16 %v1938_v54, %v1937_v52  ;;  %v2081_v52 = vld [vmem:[#allocation7 + $0x150] sm:$0xff]  ;;  %v2082_v54 = vld [vmem:[#allocation7 + $0x158] sm:$0xff] }
0x11ea   :  { %v1789_v39 = vsel %vm165_vm0, %v4608_v60, 0.0 }
0x11eb   :  { %v1786_v37 = vsel %vm165_vm0, %v4606_v59, 0.0  ;;  %3825 = vmatprep.subr.bf16.mxu1 %v3824_v55 }
0x11ec   :  { %1787 = vadd.xlane.f32.xlu0 %v1786_v37  ;;  %3827 = vmatpush3.bf16.msra.mxu1 %v3824_v55  ;;  %v3832_v55 = vpack.c.bf16 %v2082_v54, %v2081_v52 }
0x11f0   :  { %1790 = vadd.xlane.f32.xlu0 %v1789_v39 }
0x1279   :  { %v1788_v8 = vpop.xlane.xlu0 %1787 }
0x127a   :  { %v1792_v9 = vmul.f32 0.03125, %v1788_v8 }
0x127c   :  { %v1794_v13 = vsub.f32 %v4606_v59, %v1792_v9 }
0x127d   :  { %v1791_v14 = vpop.xlane.xlu0 %1790 }
0x127e   :  { %v1793_v18 = vmul.f32 0.03125, %v1791_v14  ;;  %v1796_v32 = vmul.f32 %v1794_v13, %v1794_v13 }
0x1280   :  { %v1795_v19 = vsub.f32 %v4608_v60, %v1793_v18  ;;  %v1798_v34 = vsel %vm165_vm0, %v1796_v32, 0.0 }
0x1281   :  { %1799 = vadd.xlane.f32.xlu0 %v1798_v34 }
0x1282   :  { %v1797_v15 = vmul.f32 %v1795_v19, %v1795_v19 }
0x1284   :  { %v1801_v16 = vsel %vm165_vm0, %v1797_v15, 0.0 }
0x1285   :  { %1802 = vadd.xlane.f32.xlu0 %v1801_v16 }
0x130e   :  { %v1800_v40 = vpop.xlane.xlu0 %1799 }
0x130f   :  { %v1804_v21 = vmul.f32 0.03125, %v1800_v40 }
0x1311   :  { %v1806_v31 = vadd.f32 1e-05, %v1804_v21 }
0x1312   :  { %v1803_v22 = vpop.xlane.xlu0 %1802 }
0x1313   :  { %3966 = vrsqrt.f32 %v1806_v31  ;;  %v1805_v23 = vmul.f32 0.03125, %v1803_v22 }
0x1315   :  { %v1807_v41 = vadd.f32 1e-05, %v1805_v23 }
0x1317   :  { %3968 = vrsqrt.f32 %v1807_v41 }
0x131d   :  { %v3967_v63 = vpop.eup %3966 }
0x131e   :  { %v1810_v24 = vmul.f32 %v3967_v63, %v1794_v13 }
0x1320   :  { %v1818_v25 = vmul.f32 %v3127_v42, %v1810_v24 }
0x1321   :  { %v3969_v26 = vpop.eup %3968 }
0x1322   :  { %v1811_v7 = vmul.f32 %v3969_v26, %v1795_v19  ;;  %v1826_v27 = vadd.f32 %v3128_v2, %v1818_v25 }
0x1324   :  { %v1819_v47 = vmul.f32 %v3127_v42, %v1811_v7  ;;  %3539 = vmatprep.mubr.msk.f32.mxu0 %vm165_vm0, %v1826_v27  ;;  %v2079_v27 = vld [vmem:[#allocation7 + $0x140] sm:$0xff] }
0x1326   :  { %v1827_v48 = vadd.f32 %v3128_v2, %v1819_v47  ;;  %v2080_v47 = vld [vmem:[#allocation7 + $0x148] sm:$0xff] }
0x1327   :  { %v3828_v49 = vpack.c.bf16 %v2080_v47, %v2079_v27 }
0x1328   :  { %3540 = vmatmul.mubr.msk.f32.vlgmr.msra.gmra.mrb[14].mxu0 %vm165_vm0, %v1827_v48  ;;  %v2173_v48 = vld [vmem:[#allocation7 + $0x160] sm:$0xff] }
0x1329   :  { %v3836_v51 = vpack.c.bf16 %v2174_v50, %v2173_v48  ;;  %3829 = vmatprep.subr.bf16.mxu0 %v3828_v49 }
0x132a   :  { %3831 = vmatpush3.bf16.msra.mxu0 %v3828_v49 }
0x132b   :  { %3837 = vmatprep.subr.bf16.mxu1 %v3836_v51  ;;  %3833 = vmatprep.subr.bf16.mxu0 %v3832_v55 }
0x132e   :  { %3835 = vmatpush3.bf16.msra.mxu0 %v3832_v55 }
0x13fb   :  { %v3541_v57 = vpop.f32.mrb[14].mxu0 }
0x13fc   :  { %v1919_v58 = vadd.f32 %v3541_v57, %v3129_v56  ;;  %v1913_v37 = vpop.f32.mrb[15].mxu0  ;;  %v2176_v57 = vld [vmem:[#allocation7 + $0x178] sm:$0xff] }
0x13fd   :  { %v1914_v39 = vadd.f32 %v3129_v56, %v1913_v37  ;;  %v2175_v56 = vld [vmem:[#allocation7 + $0x170] sm:$0xff] }
0x13fe   :  { %v1923_v8 = vmul.f32 -1.702, %v1919_v58 }
0x13ff   :  { %v1922_v9 = vmul.f32 -1.702, %v1914_v39 }
0x1400   :  { %v1926_v13 = vmul.f32 1.442695, %v1923_v8 }
0x1401   :  { %v1924_v14 = vmul.f32 1.442695, %v1922_v9 }
0x1402   :  { %3970 = vpow2.f32 %v1926_v13 }
0x1403   :  { %3972 = vpow2.f32 %v1924_v14 }
0x140c   :  { %v3971_v18 = vpop.eup %3970 }
0x140d   :  { %v3973_v32 = vpop.eup %3972  ;;  %v1929_v19 = vadd.f32 1.0, %v3971_v18 }
0x140e   :  { %v1928_v34 = vadd.f32 1.0, %v3973_v32  ;;  %v3135_v32 = vld [vmem:[#allocation9 + $0x12] ss:$0 sm:$0xff] }
0x140f   :  { %3974 = vrcp.f32 %v1929_v19 }
0x1410   :  { %3976 = vrcp.f32 %v1928_v34  ;;  %v3136_v34 = vld [vmem:[#allocation9 + $0x13] ss:$0 sm:$0xff] }
0x1419   :  { %v3975_v15 = vpop.eup %3974 }
0x141a   :  { %v3977_v16 = vpop.eup %3976  ;;  %v1933_v28 = vmul.f32 %v3975_v15, %v1919_v58  ;;  %v3840_v58 = vpack.c.bf16 %v2176_v57, %v2175_v56 }
0x141b   :  { %v1931_v17 = vmul.f32 %v3977_v16, %v1914_v39 }
0x141d   :  { %3550 = vmatprep.mubr.msk.f32.mxu1 %vm165_vm0, %v1931_v17 }
0x141e   :  { %3551 = vmatmul.mubr.msk.f32.vlgmr.msra.gmra.mrb[14].mxu1 %vm165_vm0, %v1933_v28 }
0x141f   :  { %3839 = vmatpush3.bf16.msra.mxu1 %v3836_v51 }
0x1420   :  { %3841 = vmatprep.subr.bf16.mxu1 %v3840_v58 }
0x1423   :  { %3843 = vmatpush3.bf16.msra.mxu1 %v3840_v58 }
0x1424   :  { %3853 = vmatprep.subr.msk.bf16.mxu1 %vm4436_vm5, %v4133_v36 }
0x14f1   :  { %v3552_v35 = vpop.f32.mrb[14].mxu1 }
0x14f2   :  { %v2011_v38 = vpop.f32.mrb[15].mxu1  ;;  %v2021_v20 = vadd.f32 %v3552_v35, %v4608_v60 }
0x14f3   :  { %v2020_v40 = vadd.f32 %v2011_v38, %v4606_v59 }
0x14f4   :  { %v2031_v22 = vadd.f32 %v3134_v30, %v2021_v20 }
0x14f5   :  { %v2030_v21 = vadd.f32 %v3134_v30, %v2020_v40  ;;  %v3137_v30 = vld [vmem:[#allocation9 + $0x14] ss:$0 sm:$0xff] }
0x14f6   :  { %v2039_v23 = vsel %vm165_vm0, %v2031_v22, 0.0 }
0x14f7   :  { %v2036_v31 = vsel %vm165_vm0, %v2030_v21, 0.0 }
0x14f8   :  { %2037 = vadd.xlane.f32.xlu0 %v2036_v31 }
0x14fc   :  { %2040 = vadd.xlane.f32.xlu0 %v2039_v23 }
0x1585   :  { %v2038_v41 = vpop.xlane.xlu0 %2037 }
0x1586   :  { %v2042_v63 = vmul.f32 0.03125, %v2038_v41 }
0x1588   :  { %v2044_v42 = vsub.f32 %v2030_v21, %v2042_v63 }
0x1589   :  { %v2041_v24 = vpop.xlane.xlu0 %2040 }
0x158a   :  { %v2043_v2 = vmul.f32 0.03125, %v2041_v24  ;;  %v2046_v25 = vmul.f32 %v2044_v42, %v2044_v42 }
0x158c   :  { %v2045_v26 = vsub.f32 %v2031_v22, %v2043_v2  ;;  %v2048_v7 = vsel %vm165_vm0, %v2046_v25, 0.0 }
0x158d   :  { %2049 = vadd.xlane.f32.xlu0 %v2048_v7 }
0x158e   :  { %v2047_v60 = vmul.f32 %v2045_v26, %v2045_v26 }
0x1590   :  { %v2051_v59 = vsel %vm165_vm0, %v2047_v60, 0.0 }
0x1591   :  { %2052 = vadd.xlane.f32.xlu0 %v2051_v59 }
0x161a   :  { %v2050_v37 = vpop.xlane.xlu0 %2049 }
0x161b   :  { %v2054_v39 = vmul.f32 0.03125, %v2050_v37 }
0x161d   :  { %v2056_v8 = vadd.f32 1e-05, %v2054_v39 }
0x161e   :  { %v2053_v9 = vpop.xlane.xlu0 %2052 }
0x161f   :  { %3978 = vrsqrt.f32 %v2056_v8  ;;  %v2055_v13 = vmul.f32 0.03125, %v2053_v9 }
0x1621   :  { %v2057_v14 = vadd.f32 1e-05, %v2055_v13 }
0x1623   :  { %3980 = vrsqrt.f32 %v2057_v14 }
0x1629   :  { %v3979_v18 = vpop.eup %3978 }
0x162a   :  { %v2060_v19 = vmul.f32 %v3979_v18, %v2044_v42 }
0x162c   :  { %v2068_v15 = vmul.f32 %v3135_v32, %v2060_v19 }
0x162d   :  { %v3981_v16 = vpop.eup %3980 }
0x162e   :  { %v2061_v17 = vmul.f32 %v3981_v16, %v2045_v26  ;;  %v2076_v28 = vadd.f32 %v3136_v34, %v2068_v15 }
0x1630   :  { %v2069_v35 = vmul.f32 %v3135_v32, %v2061_v17  ;;  %3561 = vmatprep.mubr.msk.f32.mxu0 %vm165_vm0, %v2076_v28  ;;  %3572 = vmatprep.mubr.msk.f32.mxu1 %vm165_vm0, %v2076_v28  ;;  %v2358_v28 = vld [vmem:[#allocation2 + $0x28] sm:$0xff] }
0x1632   :  { %v2077_v38 = vadd.f32 %v3136_v34, %v2069_v35 }
0x1634   :  { %3562 = vmatmul.mubr.msk.f32.vlgmr.msra.gmra.mrb[16].mxu0 %vm165_vm0, %v2077_v38  ;;  %3573 = vmatmul.mubr.msk.f32.vlgmr.msra.gmra.mrb[16].mxu1 %vm165_vm0, %v2077_v38 }
0x1635   :  { %3855 = vmatpush3.bf16.msk.msra.mxu1 %vm4436_vm5, %v4133_v36 }
0x1636   :  { %3857 = vmatprep.subr.msk.bf16.mxu1 %vm4452_vm8, %v4133_v36 }
0x1639   :  { %3859 = vmatpush3.bf16.msk.msra.mxu1 %vm4452_vm8, %v4133_v36 }
0x163a   :  { %3861 = vmatprep.subr.msk.bf16.mxu1 %vm4474_vm15, %v4133_v36 }
0x163d   :  { %3863 = vmatpush3.bf16.msk.msra.mxu1 %vm4474_vm15, %v4133_v36 }
0x163e   :  { %3865 = vmatprep.subr.msk.bf16.mxu1 %vm4481_vm1, %v4133_v36 }
0x1641   :  { %3867 = vmatpush3.bf16.msk.msra.mxu1 %vm4481_vm1, %v4133_v36 }
0x1707   :  { %v3563_v43 = vpop.f32.mrb[16].mxu0  ;;  %v3574_v20 = vpop.f32.mrb[16].mxu1 }
0x1708   :  { %v2257_v40 = vadd.f32 %v3574_v20, %v3140_v53  ;;  %v2163_v21 = vpop.f32.mrb[17].mxu0  ;;  %v2251_v31 = vpop.f32.mrb[17].mxu1  ;;  %v2169_v25 = vadd.f32 %v3563_v43, %v3137_v30 }
0x1709   :  { %v2164_v22 = vadd.f32 %v3137_v30, %v2163_v21  ;;  %v2252_v23 = vadd.f32 %v3140_v53, %v2251_v31 }
0x170a   :  { %v2349_v45 = vmul.f32 %v2257_v40, %v4321_v0  ;;  %v2351_v41 = vmul.f32 %v2257_v40, %v4327_v4  ;;  %v2353_v63 = vmul.f32 %v2257_v40, %v4330_v5  ;;  %v2355_v42 = vmul.f32 %v2257_v40, %v4333_v6 }
0x170b   :  { %2260 = vxpose.xlu0.b32.start [1/2] (short) (narrow) %v2164_v22, 32  ;;  %v2348_v36 = vmul.f32 %v2252_v23, %v4324_v3  ;;  %v2350_v46 = vmul.f32 %v2252_v23, %v4336_v10  ;;  %v2352_v24 = vmul.f32 %v2252_v23, %v4339_v11  ;;  %v2354_v2 = vmul.f32 %v2252_v23, %v4342_v12  ;;  %v2357_v10 = vld [vmem:[#allocation2 + $0x20] sm:$0xff] }
0x170c   :  { %3583 = vmatprep.mubr.msk.f32.mxu0 %vm165_vm0, %v2357_v10 }
0x170d   :  { %v3868_v26 = vpack.c.bf16 %v2349_v45, %v2348_v36  ;;  %v3872_v7 = vpack.c.bf16 %v2351_v41, %v2350_v46  ;;  %v3876_v60 = vpack.c.bf16 %v2353_v63, %v2352_v24  ;;  %v3880_v0 = vpack.c.bf16 %v2355_v42, %v2354_v2  ;;  %v2620_v45 = vld [vmem:[#allocation7 + $0x188] sm:$0xff]  ;;  %v2621_v41 = vld [vmem:[#allocation7 + $0x190] sm:$0xff]  ;;  %v2622_v42 = vld [vmem:[#allocation7 + $0x198] sm:$0xff] }
0x170e   :  { %v3888_v36 = vpack.c.bf16 %v2622_v42, %v2621_v41  ;;  %v3162_v41 = vld [vmem:[#allocation9 + $0x19] ss:$0 sm:$0xff] }
0x170f   :  { %2261 = vxpose.xlu0.b32.end [2/2] (short) (narrow) %v2169_v25, 32 }
0x178b   :  { %v2276_v4 = vpop.trf.xlu0 }
0x178c   :  { %2296 = vrot.lane.b32.xlu1 %v2276_v4, %s4127_s2 }
0x178f   :  { %v2277_v5 = vpop.trf.xlu0 }
0x1790   :  { %2308 = vrot.lane.b32.xlu1 %v2276_v4, %s4130_s4 }
0x1793   :  { %v2278_v6 = vpop.trf.xlu0 }
0x1794   :  { %2320 = vrot.lane.b32.xlu1 %v2276_v4, %s4131_s28 }
0x1797   :  { %v2279_v3 = vpop.trf.xlu0 }
0x1798   :  { %2298 = vrot.lane.b32.xlu1 %v2277_v5, %s4127_s2  ;;  %2314 = vrot.lane.b32.xlu0 %v2279_v3, %s4130_s4 }
0x179c   :  { %2310 = vrot.lane.b32.xlu1 %v2277_v5, %s4130_s4 }
0x17a0   :  { %2322 = vrot.lane.b32.xlu1 %v2277_v5, %s4131_s28 }
0x17a4   :  { %2300 = vrot.lane.b32.xlu1 %v2278_v6, %s4127_s2 }
0x17a8   :  { %2312 = vrot.lane.b32.xlu1 %v2278_v6, %s4130_s4 }
0x17ac   :  { %2302 = vrot.lane.b32.xlu1 %v2279_v3, %s4127_s2 }
0x17b0   :  { %2324 = vrot.lane.b32.xlu1 %v2278_v6, %s4131_s28 }
0x17b4   :  { %2326 = vrot.lane.b32.xlu1 %v2279_v3, %s4131_s28 }
0x17fe   :  { %v2297_v11 = vpop.permute.xlu1 %2296 }
0x17ff   :  { %v2332_v48 = vsel %vm462_vm9, %v2276_v4, %v2297_v11  ;;  %v4003_v11 = vld [vmem:[#allocation4] sm:$0xff] }
0x1802   :  { %v2309_v12 = vpop.permute.xlu1 %2308 }
0x1803   :  { %v2336_v49 = vsel %vm165_vm0, %v2332_v48, %v2309_v12 }
0x1806   :  { %v2321_v59 = vpop.permute.xlu1 %2320 }
0x1807   :  { %v2340_v50 = vsel %vm471_vm11, %v2336_v49, %v2321_v59 }
0x1808   :  { %v2344_v56 = vmul.f32 %v2340_v50, %v4383_v61 }
0x180a   :  { %v2299_v27 = vpop.permute.xlu1 %2298  ;;  %v2315_v14 = vpop.permute.xlu0 %2314 }
0x180b   :  { %v2333_v51 = vsel %vm462_vm9, %v2277_v5, %v2299_v27  ;;  %v3159_v5 = vld [vmem:[#allocation9 + $0x16] ss:$0 sm:$0xff] }
0x180e   :  { %v2311_v47 = vpop.permute.xlu1 %2310 }
0x180f   :  { %v2337_v52 = vsel %vm165_vm0, %v2333_v51, %v2311_v47 }
0x1812   :  { %v2323_v54 = vpop.permute.xlu1 %2322 }
0x1813   :  { %v2341_v55 = vsel %vm471_vm11, %v2337_v52, %v2323_v54 }
0x1814   :  { %v2345_v57 = vmul.f32 %v2341_v55, %v4388_v1 }
0x1816   :  { %v2301_v58 = vpop.permute.xlu1 %2300  ;;  %v3844_v37 = vpack.c.bf16 %v2345_v57, %v2344_v56 }
0x1817   :  { %v2334_v13 = vsel %vm462_vm9, %v2278_v6, %v2301_v58  ;;  %v4002_v6 = vld [vmem:[#allocation4 + $0x8] sm:$0xff] }
0x1818   :  { %3845 = vmatprep.subr.bf16.mxu0 %v3844_v37 }
0x1819   :  { %3847 = vmatpush3.bf16.msra.mxu0 %v3844_v37 }
0x181a   :  { %v2313_v39 = vpop.permute.xlu1 %2312 }
0x181b   :  { %v2338_v32 = vsel %vm165_vm0, %v2334_v13, %v2313_v39  ;;  %v2763_v39 = vld [vmem:[#allocation7 + $0x1a0] sm:$0xff]  ;;  %v2765_v13 = vld [vmem:[#allocation7 + $0x1b0] sm:$0xff] }
0x181e   :  { %v2303_v8 = vpop.permute.xlu1 %2302 }
0x181f   :  { %v2335_v18 = vsel %vm462_vm9, %v2279_v3, %v2303_v8  ;;  %v2764_v8 = vld [vmem:[#allocation7 + $0x1a8] sm:$0xff] }
0x1820   :  { %v2339_v61 = vsel %vm165_vm0, %v2335_v18, %v2315_v14  ;;  %v2766_v14 = vld [vmem:[#allocation7 + $0x1b8] sm:$0xff] }
0x1821   :  { %v3896_v18 = vpack.c.bf16 %v2766_v14, %v2765_v13 }
0x1822   :  { %v2325_v9 = vpop.permute.xlu1 %2324 }
0x1823   :  { %v2342_v19 = vsel %vm471_vm11, %v2338_v32, %v2325_v9  ;;  %v3892_v9 = vpack.c.bf16 %v2764_v8, %v2763_v39 }
0x1824   :  { %v2346_v15 = vmul.f32 %v2342_v19, %v4402_v29 }
0x1826   :  { %v2327_v34 = vpop.permute.xlu1 %2326 }
0x1827   :  { %v2343_v1 = vsel %vm471_vm11, %v2339_v61, %v2327_v34 }
0x1828   :  { %v2347_v16 = vmul.f32 %v2343_v1, %v4406_v33 }
0x182a   :  { %v3848_v17 = vpack.c.bf16 %v2347_v16, %v2346_v15 }
0x182c   :  { %3849 = vmatprep.subr.bf16.mxu0 %v3848_v17 }
0x182d   :  { %3851 = vmatpush3.bf16.msra.mxu0 %v3848_v17  ;;  %v3160_v17 = vld [vmem:[#allocation9 + $0x17] ss:$0 sm:$0xff] }
0x182e   :  { %3869 = vmatprep.subr.bf16.mxu0 %v3868_v26 }
0x1830   :  { %3584 = vmatmul.mubr.msk.f32.vlgmr.msra.gmra.mrb[18].mxu0 %vm165_vm0, %v2358_v28 }
0x1831   :  { %3871 = vmatpush3.bf16.msra.mxu0 %v3868_v26 }
0x1832   :  { %3873 = vmatprep.subr.bf16.mxu0 %v3872_v7 }
0x1835   :  { %3875 = vmatpush3.bf16.msra.mxu0 %v3872_v7 }
0x1836   :  { %3877 = vmatprep.subr.bf16.mxu0 %v3876_v60 }
0x1839   :  { %3879 = vmatpush3.bf16.msra.mxu0 %v3876_v60 }
0x183a   :  { %3881 = vmatprep.subr.bf16.mxu0 %v3880_v0 }
0x183d   :  { %3883 = vmatpush3.bf16.msra.mxu0 %v3880_v0 }
0x183e   :  { %3893 = vmatprep.subr.bf16.mxu0 %v3892_v9 }
0x1903   :  { %v3585_v35 = vpop.f32.mrb[18].mxu0 }
0x1904   :  { %v2431_v38 = vpop.f32.mrb[19].mxu0  ;;  %v2437_v33 = vadd.f32 %v3585_v35, %v4424_v62  ;;  %v2619_v62 = vld [vmem:[#allocation7 + $0x180] sm:$0xff]  ;;  %v3161_v35 = vld [vmem:[#allocation9 + $0x18] ss:$0 sm:$0xff] }
0x1905   :  { %v2432_v29 = vadd.f32 %v2431_v38, %v4422_v44  ;;  %v3884_v63 = vpack.c.bf16 %v2620_v45, %v2619_v62  ;;  %v2968_v62 = vld [vmem:[#allocation7 + $0x1e8] sm:$0xff] }
0x1906   :  { %v2443_v30 = vsel %vm571_vm2, %v2437_v33, -inf }
0x1907   :  { %v2440_v53 = vsel %vm571_vm2, %v2432_v29, -inf  ;;  %3885 = vmatprep.subr.bf16.mxu1 %v3884_v63 }
0x1908   :  { %2441 = vmax.xlane.f32.xlu1 %v2440_v53 }
0x190c   :  { %2444 = vmax.xlane.f32.xlu1 %v2443_v30 }
0x1995   :  { %v2442_v43 = vpop.xlane.xlu1 %2441 }
0x1996   :  { %v2446_v20 = vsub.f32 %v2432_v29, %v2442_v43 }
0x1998   :  { %v2448_v40 = vmul.f32 1.442695, %v2446_v20  ;;  %v2869_v20 = vld [vmem:[#allocation7 + $0x1c0] sm:$0xff] }
0x1999   :  { %v2445_v21 = vpop.xlane.xlu1 %2444 }
0x199a   :  { %3982 = vpow2.f32 %v2448_v40  ;;  %v2447_v31 = vsub.f32 %v2437_v33, %v2445_v21  ;;  %v2870_v40 = vld [vmem:[#allocation7 + $0x1c8] sm:$0xff] }
0x199b   :  { %v3900_v21 = vpack.c.bf16 %v2870_v40, %v2869_v20 }
0x199c   :  { %v2450_v22 = vmul.f32 1.442695, %v2447_v31  ;;  %v2871_v31 = vld [vmem:[#allocation7 + $0x1d0] sm:$0xff] }
0x199e   :  { %3984 = vpow2.f32 %v2450_v22  ;;  %v2872_v22 = vld [vmem:[#allocation7 + $0x1d8] sm:$0xff] }
0x19a4   :  { %v3983_v23 = vpop.eup %3982 }
0x19a5   :  { %3602 = vmatprep.mubr.msk.f32.mxu1 %vm571_vm2, %v3983_v23 }
0x19a8   :  { %v3985_v44 = vpop.eup %3984 }
0x19a9   :  { %3603 = vmatmul.mubr.msk.f32.vlgmr.msra.gmra.mrb[18].mxu1 %vm571_vm2, %v3985_v44 }
0x19aa   :  { %3887 = vmatpush3.bf16.msra.mxu1 %v3884_v63 }
0x19ab   :  { %3889 = vmatprep.subr.bf16.mxu1 %v3888_v36 }
0x19ae   :  { %3891 = vmatpush3.bf16.msra.mxu1 %v3888_v36 }
0x19af   :  { %3901 = vmatprep.subr.bf16.mxu1 %v3900_v21 }
0x1a7c   :  { %v3604_v46 = vpop.f32.mrb[18].mxu1 }
0x1a7d   :  { %3986 = vrcp.f32 %v3604_v46  ;;  %v2524_v24 = vpop.f32.mrb[19].mxu1 }
0x1a7e   :  { %3988 = vrcp.f32 %v2524_v24 }
0x1a87   :  { %v3987_v2 = vpop.eup %3986 }
0x1a88   :  { %v3989_v25 = vpop.eup %3988  ;;  %v2536_v7 = vmul.f32 %v3987_v2, %v3985_v44  ;;  %v2967_v44 = vld [vmem:[#allocation7 + $0x1e0] sm:$0xff] }
0x1a89   :  { %v2534_v26 = vmul.f32 %v3989_v25, %v3983_v23  ;;  %v3904_v23 = vpack.c.bf16 %v2872_v22, %v2871_v31  ;;  %v3908_v45 = vpack.c.bf16 %v2968_v62, %v2967_v44 }
0x1a8b   :  { %3621 = vmatprep.mubr.msk.f32.mxu0 %vm571_vm2, %v2534_v26 }
0x1a8c   :  { %3622 = vmatmul.mubr.msk.f32.vlgmr.msra.gmra.mrb[20].mxu0 %vm571_vm2, %v2536_v7 }
0x1a8d   :  { %3895 = vmatpush3.bf16.msra.mxu0 %v3892_v9 }
0x1a8e   :  { %3897 = vmatprep.subr.bf16.mxu0 %v3896_v18 }
0x1a91   :  { %3899 = vmatpush3.bf16.msra.mxu0 %v3896_v18 }
0x1a92   :  { %3909 = vmatprep.subr.bf16.mxu0 %v3908_v45 }
0x1b5f   :  { %v3623_v60 = vpop.f32.mrb[20].mxu0 }
0x1b60   :  { %v2609_v0 = vpop.f32.mrb[21].mxu0 }
0x1b61   :  { %3632 = vmatprep.mubr.msk.f32.mxu1 %vm165_vm0, %v2609_v0 }
0x1b62   :  { %3633 = vmatmul.mubr.msk.f32.vlgmr.msra.gmra.mrb[20].mxu1 %vm165_vm0, %v3623_v60 }
0x1b63   :  { %3903 = vmatpush3.bf16.msra.mxu1 %v3900_v21 }
0x1b64   :  { %3905 = vmatprep.subr.bf16.mxu1 %v3904_v23 }
0x1b67   :  { %3907 = vmatpush3.bf16.msra.mxu1 %v3904_v23 }
0x1c35   :  { %v3634_v4 = vpop.f32.mrb[20].mxu1 }
0x1c36   :  { %v2705_v3 = vadd.f32 %v4002_v6, %v3634_v4  ;;  %v2695_v10 = vpop.f32.mrb[21].mxu1 }
0x1c37   :  { %v2704_v12 = vadd.f32 %v4003_v11, %v2695_v10  ;;  %v2969_v11 = vld [vmem:[#allocation7 + $0x1f0] sm:$0xff] }
0x1c38   :  { %v4704_v59 = vadd.f32 %v3159_v5, %v2705_v3 }
0x1c39   :  { %v4706_v27 = vadd.f32 %v3159_v5, %v2704_v12  ;;  %v2970_v12 = vld [vmem:[#allocation7 + $0x1f8] sm:$0xff] }
0x1c3a   :  { %v2723_v47 = vsel %vm165_vm0, %v4704_v59, 0.0 }
0x1c3b   :  { %2724 = vadd.xlane.f32.xlu0 %v2723_v47  ;;  %v2720_v48 = vsel %vm165_vm0, %v4706_v27, 0.0  ;;  %v3912_v47 = vpack.c.bf16 %v2970_v12, %v2969_v11 }
0x1c3c   :  { %2721 = vadd.xlane.f32.xlu1 %v2720_v48 }
0x1cc8   :  { %v2725_v49 = vpop.xlane.xlu0 %2724 }
0x1cc9   :  { %v2727_v50 = vmul.f32 0.03125, %v2725_v49  ;;  %v2722_v51 = vpop.xlane.xlu1 %2721 }
0x1cca   :  { %v2726_v52 = vmul.f32 0.03125, %v2722_v51 }
0x1ccb   :  { %v2729_v54 = vsub.f32 %v4704_v59, %v2727_v50  ;;  %v3167_v50 = vld [vmem:[#allocation9 + $0x1a] ss:$0 sm:$0xff] }
0x1ccc   :  { %v2728_v55 = vsub.f32 %v4706_v27, %v2726_v52 }
0x1ccd   :  { %v2731_v58 = vmul.f32 %v2729_v54, %v2729_v54 }
0x1cce   :  { %v2730_v56 = vmul.f32 %v2728_v55, %v2728_v55 }
0x1ccf   :  { %v2735_v37 = vsel %vm165_vm0, %v2731_v58, 0.0 }
0x1cd0   :  { %v2732_v57 = vsel %vm165_vm0, %v2730_v56, 0.0  ;;  %v3168_v56 = vld [vmem:[#allocation9 + $0x1b] ss:$0 sm:$0xff] }
0x1cd1   :  { %2733 = vadd.xlane.f32.xlu1 %v2732_v57 }
0x1cd5   :  { %2736 = vadd.xlane.f32.xlu1 %v2735_v37 }
0x1d5e   :  { %v2734_v32 = vpop.xlane.xlu1 %2733 }
0x1d5f   :  { %v2738_v19 = vmul.f32 0.03125, %v2734_v32 }
0x1d61   :  { %v2740_v61 = vadd.f32 1e-05, %v2738_v19 }
0x1d62   :  { %v2737_v34 = vpop.xlane.xlu1 %2736 }
0x1d63   :  { %3990 = vrsqrt.f32 %v2740_v61  ;;  %v2739_v1 = vmul.f32 0.03125, %v2737_v34 }
0x1d65   :  { %v2741_v15 = vadd.f32 1e-05, %v2739_v1 }
0x1d67   :  { %3992 = vrsqrt.f32 %v2741_v15 }
0x1d6d   :  { %v3991_v16 = vpop.eup %3990 }
0x1d6e   :  { %v2744_v28 = vmul.f32 %v3991_v16, %v2728_v55 }
0x1d70   :  { %v2752_v38 = vmul.f32 %v3160_v17, %v2744_v28 }
0x1d71   :  { %v3993_v29 = vpop.eup %3992 }
0x1d72   :  { %v2745_v33 = vmul.f32 %v3993_v29, %v2729_v54  ;;  %v2760_v53 = vadd.f32 %v3161_v35, %v2752_v38 }
0x1d74   :  { %v2753_v30 = vmul.f32 %v3160_v17, %v2745_v33  ;;  %3643 = vmatprep.mubr.msk.f32.mxu0 %vm165_vm0, %v2760_v53 }
0x1d76   :  { %v2761_v43 = vadd.f32 %v3161_v35, %v2753_v30 }
0x1d78   :  { %3644 = vmatmul.mubr.msk.f32.vlgmr.msra.gmra.mrb[22].mxu0 %vm165_vm0, %v2761_v43 }
0x1d79   :  { %3911 = vmatpush3.bf16.msra.mxu0 %v3908_v45 }
0x1d7a   :  { %3913 = vmatprep.subr.bf16.mxu0 %v3912_v47 }
0x1d7d   :  { %3915 = vmatpush3.bf16.msra.mxu0 %v3912_v47 }
0x1e4b   :  { %v3645_v63 = vpop.f32.mrb[22].mxu0 }
0x1e4c   :  { %v2853_v42 = vadd.f32 %v3645_v63, %v3162_v41  ;;  %v2847_v36 = vpop.f32.mrb[23].mxu0 }
0x1e4d   :  { %v2848_v46 = vadd.f32 %v3162_v41, %v2847_v36 }
0x1e4e   :  { %v2857_v24 = vmul.f32 -1.702, %v2853_v42 }
0x1e4f   :  { %v2856_v2 = vmul.f32 -1.702, %v2848_v46 }
0x1e50   :  { %v2860_v25 = vmul.f32 1.442695, %v2857_v24 }
0x1e51   :  { %v2858_v26 = vmul.f32 1.442695, %v2856_v2 }
0x1e52   :  { %3994 = vpow2.f32 %v2860_v25 }
0x1e53   :  { %3996 = vpow2.f32 %v2858_v26 }
0x1e5c   :  { %v3995_v7 = vpop.eup %3994 }
0x1e5d   :  { %v3997_v60 = vpop.eup %3996  ;;  %v2863_v0 = vadd.f32 1.0, %v3995_v7 }
0x1e5e   :  { %v2862_v4 = vadd.f32 1.0, %v3997_v60 }
0x1e5f   :  { %3998 = vrcp.f32 %v2863_v0 }
0x1e60   :  { %4000 = vrcp.f32 %v2862_v4 }
0x1e69   :  { %v3999_v5 = vpop.eup %3998 }
0x1e6a   :  { %v4001_v6 = vpop.eup %4000  ;;  %v2867_v10 = vmul.f32 %v3999_v5, %v2853_v42 }
0x1e6b   :  { %v2865_v3 = vmul.f32 %v4001_v6, %v2848_v46 }
0x1e6d   :  { %3654 = vmatprep.mubr.msk.f32.mxu1 %vm165_vm0, %v2865_v3 }
0x1e6e   :  { %3655 = vmatmul.mubr.msk.f32.vlgmr.msra.gmra.mrb[22].mxu1 %vm165_vm0, %v2867_v10 }
0x1f41   :  { %v3656_v48 = vpop.f32.mrb[22].mxu1 }
0x1f42   :  { %v2955_v49 = vadd.f32 %v3656_v48, %v4704_v59  ;;  %v2945_v51 = vpop.f32.mrb[23].mxu1 }
0x1f43   :  { %v2954_v52 = vadd.f32 %v2945_v51, %v4706_v27 }
0x1f44   :  { %v2965_v55 = vadd.f32 %v3167_v50, %v2955_v49 }
0x1f45   :  { %v2964_v54 = vadd.f32 %v3167_v50, %v2954_v52 }
0x1f47   :  { %3665 = vmatprep.mubr.msk.f32.mxu0 %vm165_vm0, %v2964_v54 }
0x1f48   :  { %3666 = vmatmul.mubr.msk.f32.vlgmr.msra.gmra.mrb[24].mxu0 %vm165_vm0, %v2965_v55 }
0x201b   :  { %v3667_v57 = vpop.f32.mrb[24].mxu0 }
0x201c   :  { %v3057_v58 = vadd.f32 %v3667_v57, %v3168_v56  ;;  %v3051_v37 = vpop.f32.mrb[25].mxu0 }
0x201d   :  { %v3052_v39 = vadd.f32 %v3168_v56, %v3051_v37 }
0x201e   :  { %3061 = vst.msk [vmem:[%s4737_s5 + $0x8] sm:$0xff] %vm165_vm0, %v3057_v58 }
0x201f   :  { %3060 = vst.msk [vmem:[%s4737_s5] sm:$0xff] %vm165_vm0, %v3052_v39 }
0x2020   :  { %3066 = vsyncpa [#allocation3], 1 }
0x2021   :  { %3067 = vsyncpa [#allocation5], 1 }
0x2022   :  { %3068 = vsyncpa [#allocation8], 1 }

</bundles_post_ra>
